<compile_context>
chip_gen: v7x
topology: tpu7x:2x2x1
jax: 0.10.0
libtpu: 0.0.40
codegen_flags: <defaults>
</compile_context>

<pallas_src>
import jax
import jax.numpy as jnp
from jax.experimental import pallas as pl
from jax.experimental.pallas import tpu as pltpu


_KEEP_PROB = 0.7


def fully_conv_caps_kernel(x_ref, wt_ref, beff_ref, wblk_ref, bpb_ref, o_ref):
    # x_ref    : (Bt, 7, 7, PD)  dropout-masked input capsules, (P, D) packed on the lane axis
    # wt_ref   : (7, 7, PD)      composed depthwise 7x7 filter * 1/keep, tiled over P
    # beff_ref : (1, PD)         composed depthwise bias, tiled over P
    # wblk_ref : (PD, COLS)      block-diagonal pointwise weight (per-capsule (D, NCD) blocks)
    # bpb_ref  : (1, COLS)       pointwise bias, tiled over P
    # o_ref    : (Bt, COLS)
    wt = wt_ref[...]                                   # hoisted once, (7, 7, PD)

    # ---- composed depthwise stencil: conv(3x3, s2) o conv(3x3) == one 7x7 filter ----
    # Stream one stencil row at a time (small live set, no spills).
    acc = x_ref[:, 0, :, :] * wt[0]                    # (Bt, 7, PD) full-lane FMAs
    for i in range(1, 7):
        acc = acc + x_ref[:, i, :, :] * wt[i]
    feat = jnp.sum(acc, axis=1) + beff_ref[...]        # (Bt, PD)   (XLU sublane reduction)

    # ---- pointwise 1x1 conv for all capsules as one lane-dense MXU matmul ----
    out = jnp.dot(feat, wblk_ref[...], preferred_element_type=jnp.float32)
    o_ref[...] = (out + bpb_ref[...]).astype(o_ref.dtype)


def _fully_conv_caps_call(x_k, wt, beff, wblk, bpb, *, block_b):
    Bp, KH, KW, PD = x_k.shape
    COLS = wblk.shape[1]
    return pl.pallas_call(
        fully_conv_caps_kernel,
        out_shape=jax.ShapeDtypeStruct((Bp, COLS), jnp.float32),
        grid_spec=pltpu.PrefetchScalarGridSpec(
            num_scalar_prefetch=0,
            grid=(Bp // block_b,),
            in_specs=[
                pl.BlockSpec((block_b, KH, KW, PD), lambda b: (b, 0, 0, 0)),
                pl.BlockSpec((KH, KW, PD), lambda b: (0, 0, 0)),
                pl.BlockSpec((1, PD), lambda b: (0, 0)),
                pl.BlockSpec((PD, COLS), lambda b: (0, 0)),
                pl.BlockSpec((1, COLS), lambda b: (0, 0)),
            ],
            out_specs=pl.BlockSpec((block_b, COLS), lambda b: (b, 0)),
        ),
        compiler_params=pltpu.CompilerParams(
            dimension_semantics=("parallel",)),
    )(x_k, wt, beff, wblk, bpb)


def prepare_params(raw_params, num_capsule, dim_capsule, num_classes):
    """Fold torch-layout conv weights into kernel-friendly fused tensors (done once).
    Only convs[-1] is composed (the torch forward overwrites depthwise1 in its loop)."""
    P, D, NC = num_capsule, dim_capsule, num_classes
    convs_w, convs_b, final_w, final_b, point_w, point_b = raw_params

    w1 = jnp.transpose(convs_w[-1][:, 0], (1, 2, 0)).astype(jnp.float32)   # (3, 3, D)
    b1 = convs_b[-1].astype(jnp.float32)                                   # (D,)
    w2 = jnp.transpose(final_w[:, 0], (1, 2, 0)).astype(jnp.float32)       # (3, 3, D)
    b2 = final_b.astype(jnp.float32)                                       # (D,)

    # conv2(conv1(x)) for the 8x8/7x7 -> 3x3 -> 1x1 path:
    #   w_eff[i,j,d] = sum_{oi,oj} w2[oi,oj,d] * w1[i-2oi, j-2oj, d]
    #   b_eff[d]     = b2[d] + b1[d] * sum_{oi,oj} w2[oi,oj,d]
    w_eff = jnp.zeros((7, 7, D), jnp.float32)
    for oi in range(3):
        for oj in range(3):
            w_eff = w_eff.at[2 * oi:2 * oi + 3, 2 * oj:2 * oj + 3, :].add(
                w2[oi, oj][None, None, :] * w1)
    w_eff = w_eff * (1.0 / _KEEP_PROB)          # fold inverted-dropout scale into the weights
    b_eff = b2 + b1 * jnp.sum(w2, axis=(0, 1))  # biases stay unscaled

    # pack (P, D) onto the 128-lane axis: lane index = p*D + d
    PD = P * D
    wt = jnp.tile(w_eff, (1, 1, P))                                        # (7, 7, PD)
    beff = jnp.tile(b_eff, (P,))[None, :]                                  # (1, PD)

    # pointwise 1x1 conv, lane-dense: per-capsule block-diagonal weight so all P capsules go
    # through one MXU matmul; no per-capsule padding (P*NC*D is the column count).
    NCD = NC * D
    wp = jnp.transpose(point_w[:, :, 0, 0], (1, 0)).astype(jnp.float32)    # (D, NC*D)
    wblk = jnp.einsum('pq,dc->pdqc', jnp.eye(P, dtype=jnp.float32),
                      wp).reshape(PD, P * NCD)
    bpb = jnp.tile(point_b.astype(jnp.float32), (P,))[None, :]             # (1, P*NCD)

    cols_used = P * NCD
    pad = (-cols_used) % 128                    # keep output stores lane-dense if NCD is odd-sized
    if pad:
        wblk = jnp.pad(wblk, ((0, 0), (0, pad)))
        bpb = jnp.pad(bpb, ((0, 0), (0, pad)))
    return wt, beff, wblk, bpb, cols_used


def _pick_block_b(B):
    bt = -(-B // 2)               # aim for >=2 grid programs (v7x has 2 TensorCores)
    bt = max(8, min(128, bt))     # 8..128 MXU rows; keeps double-buffered tiles well under VMEM
    return -(-bt // 8) * 8        # multiple of 8 sublanes


def fully_conv_caps_forward(x, prepared, num_classes, rng_key, *, training=True):
    """x: (B, P, D, H, W) float32 -- same layout as the PyTorch module input.
    Returns conv1s: (B, NC, P, D, 1, 1) pre-routing capsule votes."""
    B, P, D, H, W = x.shape
    if H not in (7, 8) or W not in (7, 8):
        # TODO(synk): height==1 branch (identity depthwise path) not implemented.
        raise ValueError(f"cant calculate height {H}")
    wt, beff, wblk, bpb, cols_used = prepared

    # F.dropout(p=0.3, training=True): keep mask drawn with jax.random in the wrapper
    # (the TPU stateful PRNG has no interpret/CPU lowering); 1/keep scale is folded into wt.
    if training:
        keep = jax.random.bernoulli(rng_key, _KEEP_PROB, x.shape)
        x = jnp.where(keep, x, jnp.asarray(0.0, x.dtype))
    else:
        x = x * _KEEP_PROB  # cancel the 1/keep scale folded into the composed weights

    # channels-last packing + crop to the 7x7 support of the composed stencil
    # (row/col 7 of an 8x8 input hit zero weights and are never needed).
    x_k = jnp.transpose(x, (0, 3, 4, 1, 2))[:, :7, :7].reshape(B, 7, 7, P * D)

    # batch tiling: Bt batches per grid step (multiple of 8), pad B up to a multiple of Bt.
    Bt = _pick_block_b(B)
    Bp = -(-B // Bt) * Bt
    if Bp != B:
        x_k = jnp.pad(x_k, ((0, Bp - B), (0, 0), (0, 0), (0, 0)))

    out = _fully_conv_caps_call(x_k, wt, beff, wblk, bpb, block_b=Bt)  # (Bp, COLS)

    # reshaped_result.view(B, NC, D, 1, 1) + unsqueeze(2) + cat over capsules:
    out = out[:B, :cols_used].reshape(B, P, num_classes, D)
    conv1s = jnp.transpose(out, (0, 2, 1, 3))[..., None, None]       # (B, NC, P, D, 1, 1)
    # TODO(synk): attention_routing (simple_orth_attention) undefined in source; return conv1s.
    return conv1s


def init_raw_params(key, P, D, NC):
    """Deterministic synthetic parameters matching the torch module's tensor shapes."""
    ks = jax.random.split(key, 6)
    s = 0.1
    convs_w = jax.random.normal(ks[0], (3, D, 1, 3, 3), jnp.float32) * s   # 3x Conv2d(D,D,3,s2,groups=D)
    convs_b = jax.random.normal(ks[1], (3, D), jnp.float32) * s
    final_w = jax.random.normal(ks[2], (D, 1, 3, 3), jnp.float32) * s      # Conv2d(D,D,3,groups=D)
    final_b = jax.random.normal(ks[3], (D,), jnp.float32) * s
    point_w = jax.random.normal(ks[4], (D * NC, D, 1, 1), jnp.float32) * s  # Conv2d(D, D*NC, 1)
    point_b = jax.random.normal(ks[5], (D * NC,), jnp.float32) * s
    return convs_w, convs_b, final_w, final_b, point_w, point_b


if __name__ == "__main__":
    key = jax.random.PRNGKey(0)
    k_x, k_p, k_drop = jax.random.split(key, 3)

    B, P, D, H, W = 32, 8, 16, 8, 8   # [None, num_capsule=8, dim_capsule=16, h=8, w=8]
    NC = 10                           # num_classes

    x = jax.random.normal(k_x, (B, P, D, H, W), jnp.float32)
    raw = init_raw_params(k_p, P, D, NC)
    prepared = prepare_params(raw, P, D, NC)

    out = fully_conv_caps_forward(x, prepared, NC, k_drop)
    out = jax.block_until_ready(out)
    assert out.shape == (B, NC, P, D, 1, 1), out.shape
    assert out.dtype == jnp.float32
    assert bool(jnp.all(jnp.isfinite(out)))
    print("KERNEL_OK")
</pallas_src>

<mosaic_0001>
module attributes {stable_mosaic.version = 11 : i64} {
  func.func @fully_conv_caps_kernel(%arg0: i32, %arg1: memref<16x7x7x128xf32, #tpu.memory_space<vmem>>, %arg2: memref<7x7x128xf32, #tpu.memory_space<vmem>>, %arg3: memref<1x128xf32, #tpu.memory_space<vmem>>, %arg4: memref<128x1280xf32, #tpu.memory_space<vmem>>, %arg5: memref<1x1280xf32, #tpu.memory_space<vmem>>, %arg6: memref<16x1280xf32, #tpu.memory_space<vmem>>) attributes {dimension_semantics = [#tpu.dimension_semantics<parallel>], iteration_bounds = array<i64: 2>, scalar_prefetch = 0 : i64, scratch_operands = 0 : i64, tpu.core_type = #tpu.core_type<tc>, window_params = [{transform_indices = @transform_0, window_bounds = array<i64: 16, 7, 7, 128>}, {pipeline_mode = #tpu.pipeline_mode<synchronous>, transform_indices = @transform_1, window_bounds = array<i64: 7, 7, 128>}, {pipeline_mode = #tpu.pipeline_mode<synchronous>, transform_indices = @transform_2, window_bounds = array<i64: 1, 128>}, {pipeline_mode = #tpu.pipeline_mode<synchronous>, transform_indices = @transform_3, window_bounds = array<i64: 128, 1280>}, {pipeline_mode = #tpu.pipeline_mode<synchronous>, transform_indices = @transform_4, window_bounds = array<i64: 1, 1280>}, {transform_indices = @transform_5, window_bounds = array<i64: 16, 1280>}]} {
    %c0 = arith.constant 0 : index
    %c0_0 = arith.constant 0 : index
    %c0_1 = arith.constant 0 : index
    %0 = vector.load %arg2[%c0, %c0_0, %c0_1] : memref<7x7x128xf32, #tpu.memory_space<vmem>>, vector<7x7x128xf32>
    %c0_2 = arith.constant 0 : index
    %c0_3 = arith.constant 0 : index
    %c0_4 = arith.constant 0 : index
    %c0_5 = arith.constant 0 : index
    %1 = vector.load %arg1[%c0_2, %c0_3, %c0_4, %c0_5] : memref<16x7x7x128xf32, #tpu.memory_space<vmem>>, vector<16x1x7x128xf32>
    %2 = vector.shape_cast %1 : vector<16x1x7x128xf32> to vector<16x7x128xf32>
    %3 = vector.extract_strided_slice %0 {offsets = [0, 0, 0], sizes = [1, 7, 128], strides = [1, 1, 1]} : vector<7x7x128xf32> to vector<1x7x128xf32>
    %4 = vector.shape_cast %3 : vector<1x7x128xf32> to vector<7x128xf32>
    %5 = vector.shape_cast %4 : vector<7x128xf32> to vector<1x7x128xf32>
    %6 = vector.broadcast %5 : vector<1x7x128xf32> to vector<16x7x128xf32>
    %7 = arith.mulf %2, %6 : vector<16x7x128xf32>
    %c0_6 = arith.constant 0 : index
    %c1 = arith.constant 1 : index
    %c0_7 = arith.constant 0 : index
    %c0_8 = arith.constant 0 : index
    %8 = vector.load %arg1[%c0_6, %c1, %c0_7, %c0_8] : memref<16x7x7x128xf32, #tpu.memory_space<vmem>>, vector<16x1x7x128xf32>
    %9 = vector.shape_cast %8 : vector<16x1x7x128xf32> to vector<16x7x128xf32>
    %10 = vector.extract_strided_slice %0 {offsets = [1, 0, 0], sizes = [1, 7, 128], strides = [1, 1, 1]} : vector<7x7x128xf32> to vector<1x7x128xf32>
    %11 = vector.shape_cast %10 : vector<1x7x128xf32> to vector<7x128xf32>
    %12 = vector.shape_cast %11 : vector<7x128xf32> to vector<1x7x128xf32>
    %13 = vector.broadcast %12 : vector<1x7x128xf32> to vector<16x7x128xf32>
    %14 = arith.mulf %9, %13 : vector<16x7x128xf32>
    %15 = arith.addf %7, %14 : vector<16x7x128xf32>
    %c0_9 = arith.constant 0 : index
    %c2 = arith.constant 2 : index
    %c0_10 = arith.constant 0 : index
    %c0_11 = arith.constant 0 : index
    %16 = vector.load %arg1[%c0_9, %c2, %c0_10, %c0_11] : memref<16x7x7x128xf32, #tpu.memory_space<vmem>>, vector<16x1x7x128xf32>
    %17 = vector.shape_cast %16 : vector<16x1x7x128xf32> to vector<16x7x128xf32>
    %18 = vector.extract_strided_slice %0 {offsets = [2, 0, 0], sizes = [1, 7, 128], strides = [1, 1, 1]} : vector<7x7x128xf32> to vector<1x7x128xf32>
    %19 = vector.shape_cast %18 : vector<1x7x128xf32> to vector<7x128xf32>
    %20 = vector.shape_cast %19 : vector<7x128xf32> to vector<1x7x128xf32>
    %21 = vector.broadcast %20 : vector<1x7x128xf32> to vector<16x7x128xf32>
    %22 = arith.mulf %17, %21 : vector<16x7x128xf32>
    %23 = arith.addf %15, %22 : vector<16x7x128xf32>
    %c0_12 = arith.constant 0 : index
    %c3 = arith.constant 3 : index
    %c0_13 = arith.constant 0 : index
    %c0_14 = arith.constant 0 : index
    %24 = vector.load %arg1[%c0_12, %c3, %c0_13, %c0_14] : memref<16x7x7x128xf32, #tpu.memory_space<vmem>>, vector<16x1x7x128xf32>
    %25 = vector.shape_cast %24 : vector<16x1x7x128xf32> to vector<16x7x128xf32>
    %26 = vector.extract_strided_slice %0 {offsets = [3, 0, 0], sizes = [1, 7, 128], strides = [1, 1, 1]} : vector<7x7x128xf32> to vector<1x7x128xf32>
    %27 = vector.shape_cast %26 : vector<1x7x128xf32> to vector<7x128xf32>
    %28 = vector.shape_cast %27 : vector<7x128xf32> to vector<1x7x128xf32>
    %29 = vector.broadcast %28 : vector<1x7x128xf32> to vector<16x7x128xf32>
    %30 = arith.mulf %25, %29 : vector<16x7x128xf32>
    %31 = arith.addf %23, %30 : vector<16x7x128xf32>
    %c0_15 = arith.constant 0 : index
    %c4 = arith.constant 4 : index
    %c0_16 = arith.constant 0 : index
    %c0_17 = arith.constant 0 : index
    %32 = vector.load %arg1[%c0_15, %c4, %c0_16, %c0_17] : memref<16x7x7x128xf32, #tpu.memory_space<vmem>>, vector<16x1x7x128xf32>
    %33 = vector.shape_cast %32 : vector<16x1x7x128xf32> to vector<16x7x128xf32>
    %34 = vector.extract_strided_slice %0 {offsets = [4, 0, 0], sizes = [1, 7, 128], strides = [1, 1, 1]} : vector<7x7x128xf32> to vector<1x7x128xf32>
    %35 = vector.shape_cast %34 : vector<1x7x128xf32> to vector<7x128xf32>
    %36 = vector.shape_cast %35 : vector<7x128xf32> to vector<1x7x128xf32>
    %37 = vector.broadcast %36 : vector<1x7x128xf32> to vector<16x7x128xf32>
    %38 = arith.mulf %33, %37 : vector<16x7x128xf32>
    %39 = arith.addf %31, %38 : vector<16x7x128xf32>
    %c0_18 = arith.constant 0 : index
    %c5 = arith.constant 5 : index
    %c0_19 = arith.constant 0 : index
    %c0_20 = arith.constant 0 : index
    %40 = vector.load %arg1[%c0_18, %c5, %c0_19, %c0_20] : memref<16x7x7x128xf32, #tpu.memory_space<vmem>>, vector<16x1x7x128xf32>
    %41 = vector.shape_cast %40 : vector<16x1x7x128xf32> to vector<16x7x128xf32>
    %42 = vector.extract_strided_slice %0 {offsets = [5, 0, 0], sizes = [1, 7, 128], strides = [1, 1, 1]} : vector<7x7x128xf32> to vector<1x7x128xf32>
    %43 = vector.shape_cast %42 : vector<1x7x128xf32> to vector<7x128xf32>
    %44 = vector.shape_cast %43 : vector<7x128xf32> to vector<1x7x128xf32>
    %45 = vector.broadcast %44 : vector<1x7x128xf32> to vector<16x7x128xf32>
    %46 = arith.mulf %41, %45 : vector<16x7x128xf32>
    %47 = arith.addf %39, %46 : vector<16x7x128xf32>
    %c0_21 = arith.constant 0 : index
    %c6 = arith.constant 6 : index
    %c0_22 = arith.constant 0 : index
    %c0_23 = arith.constant 0 : index
    %48 = vector.load %arg1[%c0_21, %c6, %c0_22, %c0_23] : memref<16x7x7x128xf32, #tpu.memory_space<vmem>>, vector<16x1x7x128xf32>
    %49 = vector.shape_cast %48 : vector<16x1x7x128xf32> to vector<16x7x128xf32>
    %50 = vector.extract_strided_slice %0 {offsets = [6, 0, 0], sizes = [1, 7, 128], strides = [1, 1, 1]} : vector<7x7x128xf32> to vector<1x7x128xf32>
    %51 = vector.shape_cast %50 : vector<1x7x128xf32> to vector<7x128xf32>
    %52 = vector.shape_cast %51 : vector<7x128xf32> to vector<1x7x128xf32>
    %53 = vector.broadcast %52 : vector<1x7x128xf32> to vector<16x7x128xf32>
    %54 = arith.mulf %49, %53 : vector<16x7x128xf32>
    %55 = arith.addf %47, %54 : vector<16x7x128xf32>
    %cst = arith.constant dense<0.000000e+00> : vector<16x128xf32>
    %56 = vector.multi_reduction <add>, %55, %cst [1] : vector<16x7x128xf32> to vector<16x128xf32>
    %c0_24 = arith.constant 0 : index
    %c0_25 = arith.constant 0 : index
    %57 = vector.load %arg3[%c0_24, %c0_25] : memref<1x128xf32, #tpu.memory_space<vmem>>, vector<1x128xf32>
    %58 = vector.broadcast %57 : vector<1x128xf32> to vector<16x128xf32>
    %59 = arith.addf %56, %58 : vector<16x128xf32>
    %c0_26 = arith.constant 0 : index
    %c0_27 = arith.constant 0 : index
    %60 = vector.load %arg4[%c0_26, %c0_27] : memref<128x1280xf32, #tpu.memory_space<vmem>>, vector<128x1280xf32>
    %cst_28 = arith.constant dense<0.000000e+00> : vector<16x1280xf32>
    %61 = tpu.matmul %59, %60, %cst_28 {dimension_numbers = #tpu.dot_dimension_numbers<[1], [0], [0], [1], [0, 0, 1, 1], [], []>} : vector<16x128xf32>, vector<128x1280xf32>, vector<16x1280xf32> -> vector<16x1280xf32>
    %c0_29 = arith.constant 0 : index
    %c0_30 = arith.constant 0 : index
    %62 = vector.load %arg5[%c0_29, %c0_30] : memref<1x1280xf32, #tpu.memory_space<vmem>>, vector<1x1280xf32>
    %63 = vector.broadcast %62 : vector<1x1280xf32> to vector<16x1280xf32>
    %64 = arith.addf %61, %63 : vector<16x1280xf32>
    %c0_31 = arith.constant 0 : index
    %c0_32 = arith.constant 0 : index
    %65 = vector.load %arg6[%c0_31, %c0_32] : memref<16x1280xf32, #tpu.memory_space<vmem>>, vector<16x1280xf32>
    tpu.vector_store %arg6[%c0_31, %c0_32], %64 {strides = array<i32>} : memref<16x1280xf32, #tpu.memory_space<vmem>>, vector<16x1280xf32>,
    return
  }
  func.func @transform_0(%arg0: i32) -> (i32, i32, i32, i32) {
    %c0_i32 = arith.constant 0 : i32
    %c0_i32_0 = arith.constant 0 : i32
    %c0_i32_1 = arith.constant 0 : i32
    %c0_i32_2 = arith.constant 0 : i32
    return %arg0, %c0_i32, %c0_i32_0, %c0_i32_1 : i32, i32, i32, i32
  }
  func.func @transform_1(%arg0: i32) -> (i32, i32, i32) {
    %c0_i32 = arith.constant 0 : i32
    %c0_i32_0 = arith.constant 0 : i32
    %c0_i32_1 = arith.constant 0 : i32
    %c0_i32_2 = arith.constant 0 : i32
    return %c0_i32, %c0_i32_0, %c0_i32_1 : i32, i32, i32
  }
  func.func @transform_2(%arg0: i32) -> (i32, i32) {
    %c0_i32 = arith.constant 0 : i32
    %c0_i32_0 = arith.constant 0 : i32
    %c0_i32_1 = arith.constant 0 : i32
    return %c0_i32, %c0_i32_0 : i32, i32
  }
  func.func @transform_3(%arg0: i32) -> (i32, i32) {
    %c0_i32 = arith.constant 0 : i32
    %c0_i32_0 = arith.constant 0 : i32
    %c0_i32_1 = arith.constant 0 : i32
    return %c0_i32, %c0_i32_0 : i32, i32
  }
  func.func @transform_4(%arg0: i32) -> (i32, i32) {
    %c0_i32 = arith.constant 0 : i32
    %c0_i32_0 = arith.constant 0 : i32
    %c0_i32_1 = arith.constant 0 : i32
    return %c0_i32, %c0_i32_0 : i32, i32
  }
  func.func @transform_5(%arg0: i32) -> (i32, i32) {
    %c0_i32 = arith.constant 0 : i32
    %c0_i32_0 = arith.constant 0 : i32
    return %arg0, %c0_i32 : i32, i32
  }
}

</mosaic_0001>

<bundles_post_ra>
// kernel: tpu_custom_call.1
= control target key start
LH: loop header
LB: loop body
LE: loop exit
PB: predicated region body
PF: predicated region fallthrough
CT: control target
= control target key end

     0   :  { %10 = vsyncpa [#allocation3], 0  ;;  %s3111_s0 = inlined_call_operand.vmem [shape: f32[32,7,7,128], index: 0, kind: input, shape index: {}]   ;;  %s3112_s1 = inlined_call_operand.vmem [shape: f32[7,7,128], index: 1, kind: input, shape index: {}]   ;;  %s3113_s2 = inlined_call_operand.vmem [shape: f32[1,128], index: 2, kind: input, shape index: {}]   ;;  %s3114_s3 = inlined_call_operand.vmem [shape: f32[128,1280], index: 3, kind: input, shape index: {}]   ;;  %s3115_s4 = inlined_call_operand.vmem [shape: f32[1,1280], index: 4, kind: input, shape index: {}]   ;;  %s3116_s5 = inlined_call_operand.hbm [shape: f32[32,1280], index: 5, kind: output, shape index: {}]  }
   0x1   :  { %12 = vsyncpa [#allocation3 + $0x1], 0  ;;  %s1874_s18 = smov 0   ;;  %s1876_s19 = smov 0  }
   0x2   :  { %s1878_s20 = smov 0   ;;  %s1880_s21 = smov 0  }
   0x3 LB: > { %s1895_s22 = sadd.s32 4294967295, %s1838_s21   ;;  %s1447_s23 = sadd.s32 4294967294, %s1838_s21   ;;  %s1838_s21 = sphi %s1880_s21, %s3194_s21   ;;  %s1834_s20 = sphi %s1878_s20, %s3193_s20   ;;  %s1830_s19 = sphi %s1876_s19, %s3192_s19   ;;  %s1826_s18 = sphi %s1874_s18, %s3191_s18  }
   0x4   : > { %s1899_s24 = sadd.s32 1, %s1838_s21   ;;  %s135_s25 = sadd.s32 1, %s1834_s20 }
   0x5   : > { %s132_s26 = ssub.s32 %s1838_s21, %s1899_s24  ;;  %p145_p0 = scmp.ne.s32.totalorder %s1834_s20, %s1830_s19 }
   0x6   : > { %p133_p1 = scmp.eq.s32.totalorder %s132_s26, 0  ;;  %p146_p2 = scmp.eq.s32.totalorder %s1895_s22, 1 }
   0x7   : > { %p151_p3 = scmp.ne.s32.totalorder %s1830_s19, %s1826_s18  ;;  %p152_p4 = scmp.eq.s32.totalorder %s1447_s23, 1 }
   0x8   : > { %s1910_s27 = scalar_select %p133_p1, %s1834_s20, %s135_s25  }
   0x9   : > { %p1912_p5 = por %p146_p2, %p145_p0  ;;  %p1916_p6 = por %p152_p4, %p151_p3 }
   0xa   : > { %p1450_p7 = scmp.ge.s32.totalorder %s1838_s21, 1  ;;  %p192_p8 = scmp.lt.s32.totalorder %s1838_s21, 3 }
   0xc   : > { %p193_p9 = pnand %p1450_p7, %p192_p8 }
   0xe   : > { %196 = sbr.rel (%p193_p9) target bundleno = 422 (0x1a6), region = 40 }
  0x15   : > { %v699_v0 = vld [vmem:[%s3114_s3 + $0x8] sm:$0xff]  ;;  %v709_v1 = vld [vmem:[%s3114_s3 + $0x58] sm:$0xff]  ;;  %v698_v5 = vld [vmem:[%s3114_s3] sm:$0xff]  ;;  %v3117_v7 = vmov 0.0   ;;  %s1451_s30 = sshll.u32 %s1895_s22, 4  ;;  %vm562_vm0 = vcmask 1046528  }
  0x16   : > { %v701_v2 = vld [vmem:[%s3114_s3 + $0x18] sm:$0xff]  ;;  %v1555_v3 = vpack.c.bf16 %v709_v1, %v699_v0  ;;  %v711_v4 = vld [vmem:[%s3114_s3 + $0x68] sm:$0xff]  ;;  %v708_v6 = vld [vmem:[%s3114_s3 + $0x50] sm:$0xff]  ;;  %1029 = vmatprep.mubr.f32.mxu0 %v3117_v7  ;;  %1106 = vmatprep.mubr.f32.mxu1 %v3117_v7  ;;  %p2026_p10 = scmp.lt.s32.totalorder %s1451_s30, 31  ;;  %vm929_vm1 = vcmask 1041409   ;;  %vm932_vm2 = vcmask 1042434  }
  0x17   : > { %v1587_v8 = vpack.c.bf16 %v711_v4, %v701_v2  ;;  %v1557_v9 = vpack.c.bf16 %v708_v6, %v698_v5  ;;  %v700_v10 = vld [vmem:[%s3114_s3 + $0x10] sm:$0xff]  ;;  %v710_v11 = vld [vmem:[%s3114_s3 + $0x60] sm:$0xff]  ;;  %v719_v12 = vld [vmem:[%s3114_s3 + $0xa8] sm:$0xff]  ;;  %vm935_vm3 = vcmask 1043459   ;;  %vm938_vm4 = vcmask 1044484   ;;  %s1733_s14 = smul.u32 2560, %s1895_s22 }
  0x18   : > { %1556 = vmatprep.subr.bf16.mxu0 %v1555_v3  ;;  %v1589_v13 = vpack.c.bf16 %v710_v11, %v700_v10  ;;  %v729_v14 = vld [vmem:[%s3114_s3 + $0xf8] sm:$0xff]  ;;  %v731_v16 = vld [vmem:[%s3114_s3 + $0x108] sm:$0xff]  ;;  %v718_v19 = vld [vmem:[%s3114_s3 + $0xa0] sm:$0xff]  ;;  %s3196_s30 = smov (!%p2026_p10, %s1451_s30), 31  ;;  %vm941_vm5 = vcmask 1045509   ;;  %vm944_vm6 = vcmask 1046534  }
  0x19   : > { %v721_v15 = vld [vmem:[%s3114_s3 + $0xb8] sm:$0xff]  ;;  %1588 = vmatprep.subr.bf16.mxu1 %v1587_v8  ;;  %1558 = vmatpush1.bf16.msra.mxu0 %v1557_v9  ;;  %v1559_v17 = vpack.c.bf16 %v729_v14, %v719_v12  ;;  %v728_v20 = vld [vmem:[%s3114_s3 + $0xf0] sm:$0xff]  ;;  %v730_v23 = vld [vmem:[%s3114_s3 + $0x100] sm:$0xff]  ;;  %s1732_s25 = smul.u32 56, %s3196_s30  ;;  %vm947_vm7 = vcmask 1047559   ;;  %s3060_s26 = scalar_lea.hbm %s3116_s5, %s1733_s14 }
  0x1a   : > { %v1591_v18 = vpack.c.bf16 %v731_v16, %v721_v15  ;;  %v720_v21 = vld [vmem:[%s3114_s3 + $0xb0] sm:$0xff]  ;;  %1590 = vmatpush1.bf16.msra.mxu1 %v1589_v13  ;;  %v1561_v22 = vpack.c.bf16 %v728_v20, %v718_v19  ;;  %v739_v24 = vld [vmem:[%s3114_s3 + $0x148] sm:$0xff]  ;;  %v749_v25 = vld [vmem:[%s3114_s3 + $0x198] sm:$0xff]  ;;  %s1841_s9 = smov [#allocation2]  }
  0x1b   : > { %1560 = vmatprep.subr.bf16.mxu0 %v1559_v17  ;;  %v1593_v26 = vpack.c.bf16 %v730_v23, %v720_v21  ;;  %v1563_v27 = vpack.c.bf16 %v749_v25, %v739_v24  ;;  %v741_v28 = vld [vmem:[%s3114_s3 + $0x158] sm:$0xff]  ;;  %v751_v29 = vld [vmem:[%s3114_s3 + $0x1a8] sm:$0xff]  ;;  %v738_v30 = vld [vmem:[%s3114_s3 + $0x140] sm:$0xff]  ;;  %s2146_s17 = scalar_lea.vmem %s3111_s0, %s1732_s25  ;;  %s1780_s7 = sshll.u32 %s1841_s9, 4  ;;  %s1781_s7 = int_to_ptr.vmem [resolvable:$false] %s1780_s7 }
  0x1c   : > { %1592 = vmatprep.subr.bf16.mxu1 %v1591_v18  ;;  %v1595_v31 = vpack.c.bf16 %v751_v29, %v741_v28  ;;  %v748_v32 = vld [vmem:[%s3114_s3 + $0x190] sm:$0xff]  ;;  %v750_v34 = vld [vmem:[%s3114_s3 + $0x1a0] sm:$0xff]  ;;  %v759_v36 = vld [vmem:[%s3114_s3 + $0x1e8] sm:$0xff]  ;;  %s1782_s8 = scalar_lea.vmem %s1781_s7, 5120 }
  0x1d   : > { %v740_v33 = vld [vmem:[%s3114_s3 + $0x150] sm:$0xff]  ;;  %1562 = vmatpush1.bf16.msra.mxu0 %v1561_v22  ;;  %v1565_v35 = vpack.c.bf16 %v748_v32, %v738_v30  ;;  %v769_v37 = vld [vmem:[%s3114_s3 + $0x238] sm:$0xff]  ;;  %v771_v41 = vld [vmem:[%s3114_s3 + $0x248] sm:$0xff] }
  0x1e   : > { %v761_v38 = vld [vmem:[%s3114_s3 + $0x1f8] sm:$0xff]  ;;  %1594 = vmatpush1.bf16.msra.mxu1 %v1593_v26  ;;  %1564 = vmatprep.subr.bf16.mxu0 %v1563_v27  ;;  %v1597_v39 = vpack.c.bf16 %v750_v34, %v740_v33  ;;  %v1567_v40 = vpack.c.bf16 %v769_v37, %v759_v36  ;;  %v758_v42 = vld [vmem:[%s3114_s3 + $0x1e0] sm:$0xff]  ;;  %v768_v43 = vld [vmem:[%s3114_s3 + $0x230] sm:$0xff] }
  0x1f   : > { %1596 = vmatprep.subr.bf16.mxu1 %v1595_v31  ;;  %v1599_v44 = vpack.c.bf16 %v771_v41, %v761_v38  ;;  %v760_v45 = vld [vmem:[%s3114_s3 + $0x1f0] sm:$0xff]  ;;  %v770_v46 = vld [vmem:[%s3114_s3 + $0x240] sm:$0xff]  ;;  %v779_v47 = vld [vmem:[%s3114_s3 + $0x288] sm:$0xff]  ;;  %v1569_v51 = vpack.c.bf16 %v768_v43, %v758_v42 }
  0x20   : > { %v789_v48 = vld [vmem:[%s3114_s3 + $0x2d8] sm:$0xff]  ;;  %v791_v50 = vld [vmem:[%s3114_s3 + $0x2e8] sm:$0xff]  ;;  %v1601_v52 = vpack.c.bf16 %v770_v46, %v760_v45  ;;  %v778_v54 = vld [vmem:[%s3114_s3 + $0x280] sm:$0xff] }
  0x21   : > { %v781_v49 = vld [vmem:[%s3114_s3 + $0x298] sm:$0xff]  ;;  %1566 = vmatpush1.bf16.msra.mxu0 %v1565_v35  ;;  %v1571_v53 = vpack.c.bf16 %v789_v48, %v779_v47  ;;  %v788_v55 = vld [vmem:[%s3114_s3 + $0x2d0] sm:$0xff]  ;;  %v790_v58 = vld [vmem:[%s3114_s3 + $0x2e0] sm:$0xff] }
  0x22   : > { %1598 = vmatpush1.bf16.msra.mxu1 %v1597_v39  ;;  %1568 = vmatprep.subr.bf16.mxu0 %v1567_v40  ;;  %v780_v56 = vld [vmem:[%s3114_s3 + $0x290] sm:$0xff]  ;;  %v1603_v57 = vpack.c.bf16 %v791_v50, %v781_v49  ;;  %v799_v59 = vld [vmem:[%s3114_s3 + $0x328] sm:$0xff]  ;;  %v809_v60 = vld [vmem:[%s3114_s3 + $0x378] sm:$0xff]  ;;  %v1573_v63 = vpack.c.bf16 %v788_v55, %v778_v54 }
  0x23   : > { %1600 = vmatprep.subr.bf16.mxu1 %v1599_v44  ;;  %v801_v61 = vld [vmem:[%s3114_s3 + $0x338] sm:$0xff]  ;;  %v811_v62 = vld [vmem:[%s3114_s3 + $0x388] sm:$0xff]  ;;  %v798_v0 = vld [vmem:[%s3114_s3 + $0x320] sm:$0xff]  ;;  %v1605_v2 = vpack.c.bf16 %v790_v58, %v780_v56  ;;  %v1575_v3 = vpack.c.bf16 %v809_v60, %v799_v59 }
  0x24   : > { %v808_v1 = vld [vmem:[%s3114_s3 + $0x370] sm:$0xff]  ;;  %v810_v5 = vld [vmem:[%s3114_s3 + $0x380] sm:$0xff]  ;;  %v819_v6 = vld [vmem:[%s3114_s3 + $0x3c8] sm:$0xff]  ;;  %v1607_v8 = vpack.c.bf16 %v811_v62, %v801_v61 }
  0x25   : > { %1570 = vmatpush1.bf16.msra.mxu0 %v1569_v51  ;;  %v800_v4 = vld [vmem:[%s3114_s3 + $0x330] sm:$0xff]  ;;  %v829_v9 = vld [vmem:[%s3114_s3 + $0x418] sm:$0xff]  ;;  %v831_v11 = vld [vmem:[%s3114_s3 + $0x428] sm:$0xff]  ;;  %v1577_v16 = vpack.c.bf16 %v808_v1, %v798_v0 }
  0x26   : > { %1602 = vmatpush1.bf16.msra.mxu1 %v1601_v52  ;;  %1572 = vmatprep.subr.bf16.mxu0 %v1571_v53  ;;  %v821_v10 = vld [vmem:[%s3114_s3 + $0x3d8] sm:$0xff]  ;;  %v818_v12 = vld [vmem:[%s3114_s3 + $0x3c0] sm:$0xff]  ;;  %v828_v13 = vld [vmem:[%s3114_s3 + $0x410] sm:$0xff]  ;;  %v1609_v20 = vpack.c.bf16 %v810_v5, %v800_v4  ;;  %v1579_v21 = vpack.c.bf16 %v829_v9, %v819_v6 }
  0x27   : > { %1604 = vmatprep.subr.bf16.mxu1 %v1603_v57  ;;  %v820_v14 = vld [vmem:[%s3114_s3 + $0x3d0] sm:$0xff]  ;;  %v830_v15 = vld [vmem:[%s3114_s3 + $0x420] sm:$0xff]  ;;  %v839_v17 = vld [vmem:[%s3114_s3 + $0x468] sm:$0xff]  ;;  %v1611_v25 = vpack.c.bf16 %v831_v11, %v821_v10  ;;  %v1581_v32 = vpack.c.bf16 %v828_v13, %v818_v12 }
  0x28   : > { %v849_v18 = vld [vmem:[%s3114_s3 + $0x4b8] sm:$0xff]  ;;  %v851_v22 = vld [vmem:[%s3114_s3 + $0x4c8] sm:$0xff]  ;;  %v2121_v23 = vld [vmem:[%s3114_s3 + $0x460] sm:$0xff]  ;;  %v1613_v33 = vpack.c.bf16 %v830_v15, %v820_v14 }
  0x29   : > { %1574 = vmatpush1.bf16.msra.mxu0 %v1573_v63  ;;  %v841_v19 = vld [vmem:[%s3114_s3 + $0x478] sm:$0xff]  ;;  %v2126_v24 = vld [vmem:[%s3114_s3 + $0x4b0] sm:$0xff]  ;;  %v2136_v27 = vld [vmem:[%s3114_s3 + $0x4c0] sm:$0xff]  ;;  %v1583_v36 = vpack.c.bf16 %v849_v18, %v839_v17 }
  0x2a   : > { %1606 = vmatpush1.bf16.msra.mxu1 %v1605_v2  ;;  %1576 = vmatprep.subr.bf16.mxu0 %v1575_v3  ;;  %v2131_v26 = vld [vmem:[%s3114_s3 + $0x470] sm:$0xff]  ;;  %v2141_v28 = vld [vmem:[%s3114_s3 + $0x28] sm:$0xff]  ;;  %v2151_v29 = vld [vmem:[%s3114_s3 + $0x78] sm:$0xff]  ;;  %v1615_v37 = vpack.c.bf16 %v851_v22, %v841_v19  ;;  %v1585_v38 = vpack.c.bf16 %v2126_v24, %v2121_v23 }
  0x2b   : > { %1608 = vmatprep.subr.bf16.mxu1 %v1607_v8  ;;  %v2156_v30 = vld [vmem:[%s3114_s3 + $0x38] sm:$0xff]  ;;  %v2161_v31 = vld [vmem:[%s3114_s3 + $0x88] sm:$0xff]  ;;  %v2166_v34 = vld [vmem:[%s3112_s1] sm:$0x7f]  ;;  %v1617_v42 = vpack.c.bf16 %v2136_v27, %v2131_v26  ;;  %v1619_v43 = vpack.c.bf16 %v2151_v29, %v2141_v28 }
  0x2c   : > { %v2171_v35 = vld [vmem:[%s3112_s1 + $0x8] sm:$0x7f]  ;;  %v236_v39 = vld [vmem:[%s2146_s17] sm:$0x7f]  ;;  %v237_v40 = vld [vmem:[%s2146_s17 + $0x38] sm:$0x7f]  ;;  %v1651_v44 = vpack.c.bf16 %v2161_v31, %v2156_v30 }
  0x2d   : > { %1578 = vmatpush1.bf16.msra.mxu0 %v1577_v16  ;;  %v238_v41 = vld [vmem:[%s2146_s17 + $0x70] sm:$0x7f]  ;;  %v239_v45 = vld [vmem:[%s2146_s17 + $0xa8] sm:$0x7f]  ;;  %v240_v46 = vld [vmem:[%s2146_s17 + $0xe0] sm:$0x7f]  ;;  %v252_v48 = vmul.f32 %v236_v39, %v2166_v34  ;;  %v253_v51 = vmul.f32 %v237_v40, %v2166_v34 }
  0x2e   : > { %1610 = vmatpush1.bf16.msra.mxu1 %v1609_v20  ;;  %1580 = vmatprep.subr.bf16.mxu0 %v1579_v21  ;;  %v241_v47 = vld [vmem:[%s2146_s17 + $0x118] sm:$0x7f]  ;;  %v242_v49 = vld [vmem:[%s2146_s17 + $0x150] sm:$0x7f]  ;;  %v243_v50 = vld [vmem:[%s2146_s17 + $0x188] sm:$0x7f]  ;;  %v254_v52 = vmul.f32 %v238_v41, %v2166_v34  ;;  %v255_v53 = vmul.f32 %v239_v45, %v2166_v34  ;;  %v256_v54 = vmul.f32 %v240_v46, %v2166_v34 }
  0x2f   : > { %1612 = vmatprep.subr.bf16.mxu1 %v1611_v25  ;;  %v1453_v55 = vld [vmem:[%s2146_s17 + $0x8] sm:$0x7f]  ;;  %v2198_v56 = vld [vmem:[%s3112_s1 + $0x10] sm:$0x7f]  ;;  %v257_v57 = vmul.f32 %v241_v47, %v2166_v34  ;;  %v258_v58 = vmul.f32 %v242_v49, %v2166_v34  ;;  %v259_v59 = vmul.f32 %v243_v50, %v2166_v34  ;;  %v1454_v60 = vld [vmem:[%s2146_s17 + $0x40] sm:$0x7f] }
  0x30   : > { %v1455_v61 = vld [vmem:[%s2146_s17 + $0x78] sm:$0x7f]  ;;  %v1456_v62 = vld [vmem:[%s2146_s17 + $0xb0] sm:$0x7f]  ;;  %v285_v63 = vmul.f32 %v1453_v55, %v2171_v35  ;;  %v1457_v0 = vld [vmem:[%s2146_s17 + $0xe8] sm:$0x7f]  ;;  %v286_v3 = vmul.f32 %v1454_v60, %v2171_v35 }
  0x31   : > { %1582 = vmatpush1.bf16.msra.mxu0 %v1581_v32  ;;  %v1458_v1 = vld [vmem:[%s2146_s17 + $0x120] sm:$0x7f]  ;;  %v1459_v2 = vld [vmem:[%s2146_s17 + $0x158] sm:$0x7f]  ;;  %v287_v4 = vmul.f32 %v1455_v61, %v2171_v35  ;;  %v288_v5 = vmul.f32 %v1456_v62, %v2171_v35  ;;  %v1460_v6 = vld [vmem:[%s2146_s17 + $0x190] sm:$0x7f]  ;;  %v289_v8 = vmul.f32 %v1457_v0, %v2171_v35 }
  0x32   : > { %1614 = vmatpush1.bf16.msra.mxu1 %v1613_v33  ;;  %1584 = vmatprep.subr.bf16.mxu0 %v1583_v36  ;;  %v290_v9 = vmul.f32 %v1458_v1, %v2171_v35  ;;  %v291_v10 = vmul.f32 %v1459_v2, %v2171_v35  ;;  %v301_v11 = vadd.f32 %v285_v63, %v252_v48  ;;  %v1469_v12 = vld [vmem:[%s2146_s17 + $0x10] sm:$0x7f]  ;;  %v1470_v13 = vld [vmem:[%s2146_s17 + $0x48] sm:$0x7f]  ;;  %v1471_v18 = vld [vmem:[%s2146_s17 + $0x80] sm:$0x7f] }
  0x33   : > { %1616 = vmatprep.subr.bf16.mxu1 %v1615_v37  ;;  %v292_v14 = vmul.f32 %v1460_v6, %v2171_v35  ;;  %v302_v15 = vadd.f32 %v286_v3, %v253_v51  ;;  %v303_v16 = vadd.f32 %v287_v4, %v254_v52  ;;  %v304_v17 = vadd.f32 %v288_v5, %v255_v53  ;;  %v1472_v19 = vld [vmem:[%s2146_s17 + $0xb8] sm:$0x7f]  ;;  %v1473_v20 = vld [vmem:[%s2146_s17 + $0xf0] sm:$0x7f]  ;;  %v1474_v24 = vld [vmem:[%s2146_s17 + $0x128] sm:$0x7f] }
  0x34   : > { %v305_v21 = vadd.f32 %v289_v8, %v256_v54  ;;  %v306_v22 = vadd.f32 %v290_v9, %v257_v57  ;;  %v307_v23 = vadd.f32 %v291_v10, %v258_v58  ;;  %v1475_v25 = vld [vmem:[%s2146_s17 + $0x160] sm:$0x7f]  ;;  %v1476_v26 = vld [vmem:[%s2146_s17 + $0x198] sm:$0x7f]  ;;  %v334_v27 = vmul.f32 %v1469_v12, %v2198_v56  ;;  %v1486_v39 = vld [vmem:[%s2146_s17 + $0x50] sm:$0x7f] }
  0x35   : > { %1586 = vmatpush1.bf16.msra.mxu0 %v1585_v38  ;;  %v2230_v28 = vld [vmem:[%s3112_s1 + $0x18] sm:$0x7f]  ;;  %v308_v29 = vadd.f32 %v292_v14, %v259_v59  ;;  %v335_v30 = vmul.f32 %v1470_v13, %v2198_v56  ;;  %v336_v31 = vmul.f32 %v1471_v18, %v2198_v56  ;;  %v337_v33 = vmul.f32 %v1472_v19, %v2198_v56  ;;  %v1487_v40 = vld [vmem:[%s2146_s17 + $0x88] sm:$0x7f]  ;;  %v1488_v41 = vld [vmem:[%s2146_s17 + $0xc0] sm:$0x7f] }
  0x36   : > { %1618 = vmatpush1.bf16.msra.mxu1 %v1617_v42  ;;  %1620 = vmatprep.subr.bf16.mxu0 %v1619_v43  ;;  %v1485_v32 = vld [vmem:[%s2146_s17 + $0x18] sm:$0x7f]  ;;  %v338_v36 = vmul.f32 %v1473_v20, %v2198_v56  ;;  %v339_v37 = vmul.f32 %v1474_v24, %v2198_v56  ;;  %v340_v38 = vmul.f32 %v1475_v25, %v2198_v56  ;;  %v1491_v48 = vld [vmem:[%s2146_s17 + $0x168] sm:$0x7f]  ;;  %v1492_v53 = vld [vmem:[%s2146_s17 + $0x1a0] sm:$0x7f] }
  0x37   : > { %1652 = vmatprep.subr.bf16.mxu1 %v1651_v44  ;;  %v341_v42 = vmul.f32 %v1476_v26, %v2198_v56  ;;  %v350_v43 = vadd.f32 %v334_v27, %v301_v11  ;;  %v351_v45 = vadd.f32 %v335_v30, %v302_v15  ;;  %v352_v46 = vadd.f32 %v336_v31, %v303_v16  ;;  %v1489_v47 = vld [vmem:[%s2146_s17 + $0xf8] sm:$0x7f]  ;;  %v1490_v44 = vld [vmem:[%s2146_s17 + $0x130] sm:$0x7f]  ;;  %v2250_v54 = vld [vmem:[%s3112_s1 + $0x20] sm:$0x7f] }
  0x38   : > { %v353_v49 = vadd.f32 %v337_v33, %v304_v17  ;;  %v354_v50 = vadd.f32 %v338_v36, %v305_v21  ;;  %v355_v51 = vadd.f32 %v339_v37, %v306_v22  ;;  %v356_v52 = vadd.f32 %v340_v38, %v307_v23  ;;  %3140 = vst [vmem:[#allocation5_spill] sm:$0xff] %v2250_v54  ;;  %v1501_v60 = vld [vmem:[%s2146_s17 + $0x20] sm:$0x7f]  ;;  %v1502_v1 = vld [vmem:[%s2146_s17 + $0x58] sm:$0x7f] }
  0x39   : > { %v357_v55 = vadd.f32 %v341_v42, %v308_v29  ;;  %v383_v57 = vmul.f32 %v1485_v32, %v2230_v28  ;;  %v384_v58 = vmul.f32 %v1486_v39, %v2230_v28  ;;  %v385_v59 = vmul.f32 %v1487_v40, %v2230_v28  ;;  %v1503_v2 = vld [vmem:[%s2146_s17 + $0x90] sm:$0x7f]  ;;  %v1504_v3 = vld [vmem:[%s2146_s17 + $0xc8] sm:$0x7f]  ;;  %v1505_v9 = vld [vmem:[%s2146_s17 + $0x100] sm:$0x7f] }
  0x3a   : > { %v386_v61 = vmul.f32 %v1488_v41, %v2230_v28  ;;  %v387_v62 = vmul.f32 %v1489_v47, %v2230_v28  ;;  %v388_v63 = vmul.f32 %v1490_v44, %v2230_v28  ;;  %v389_v0 = vmul.f32 %v1491_v48, %v2230_v28  ;;  %v1506_v10 = vld [vmem:[%s2146_s17 + $0x138] sm:$0x7f]  ;;  %v1507_v11 = vld [vmem:[%s2146_s17 + $0x170] sm:$0x7f]  ;;  %v1508_v16 = vld [vmem:[%s2146_s17 + $0x1a8] sm:$0x7f] }
  0x3b   : > { %v390_v4 = vmul.f32 %v1492_v53, %v2230_v28  ;;  %v399_v5 = vadd.f32 %v383_v57, %v350_v43  ;;  %v400_v6 = vadd.f32 %v384_v58, %v351_v45  ;;  %v401_v8 = vadd.f32 %v385_v59, %v352_v46  ;;  %v2271_v17 = vld [vmem:[%s3112_s1 + $0x28] sm:$0x7f]  ;;  %v1518_v27 = vld [vmem:[%s2146_s17 + $0x60] sm:$0x7f]  ;;  %v1519_v29 = vld [vmem:[%s2146_s17 + $0x98] sm:$0x7f] }
  0x3c   : > { %v402_v12 = vadd.f32 %v386_v61, %v353_v49  ;;  %v403_v13 = vadd.f32 %v387_v62, %v354_v50  ;;  %v404_v14 = vadd.f32 %v388_v63, %v355_v51  ;;  %v405_v15 = vadd.f32 %v389_v0, %v356_v52  ;;  %3141 = vst [vmem:[#allocation6_spill] sm:$0xff] %v2271_v17  ;;  %v1517_v22 = vld [vmem:[%s2146_s17 + $0x28] sm:$0x7f]  ;;  %v1520_v30 = vld [vmem:[%s2146_s17 + $0xd0] sm:$0x7f]  ;;  %v2594_v7 = vld [vmem:[%s3114_s3 + $0x438] sm:$0xff] }
  0x3d   : > { %v406_v18 = vadd.f32 %v390_v4, %v357_v55  ;;  %v432_v19 = vmul.f32 %v1501_v60, %v2250_v54  ;;  %v433_v20 = vmul.f32 %v1502_v1, %v2250_v54  ;;  %v434_v21 = vmul.f32 %v1503_v2, %v2250_v54  ;;  %v1521_v37 = vld [vmem:[%s2146_s17 + $0x108] sm:$0x7f]  ;;  %v1522_v38 = vld [vmem:[%s2146_s17 + $0x140] sm:$0x7f]  ;;  %v1523_v39 = vld [vmem:[%s2146_s17 + $0x178] sm:$0x7f] }
  0x3e   : > { %v435_v23 = vmul.f32 %v1504_v3, %v2250_v54  ;;  %v436_v24 = vmul.f32 %v1505_v9, %v2250_v54  ;;  %v437_v25 = vmul.f32 %v1506_v10, %v2250_v54  ;;  %v438_v26 = vmul.f32 %v1507_v11, %v2250_v54  ;;  %v1524_v45 = vld [vmem:[%s2146_s17 + $0x1b0] sm:$0x7f]  ;;  %v1534_v57 = vld [vmem:[%s2146_s17 + $0x68] sm:$0x7f]  ;;  %v1535_v58 = vld [vmem:[%s2146_s17 + $0xa0] sm:$0x7f] }
  0x3f   : > { %v439_v31 = vmul.f32 %v1508_v16, %v2250_v54  ;;  %v448_v32 = vadd.f32 %v432_v19, %v399_v5  ;;  %v449_v33 = vadd.f32 %v433_v20, %v400_v6  ;;  %v450_v36 = vadd.f32 %v434_v21, %v401_v8  ;;  %v2292_v46 = vld [vmem:[%s3112_s1 + $0x30] sm:$0x7f]  ;;  %v1536_v59 = vld [vmem:[%s2146_s17 + $0xd8] sm:$0x7f]  ;;  %v1538_v1 = vld [vmem:[%s2146_s17 + $0x148] sm:$0x7f] }
  0x40   : > { %v451_v40 = vadd.f32 %v435_v23, %v402_v12  ;;  %v452_v41 = vadd.f32 %v436_v24, %v403_v13  ;;  %v453_v42 = vadd.f32 %v437_v25, %v404_v14  ;;  %v454_v43 = vadd.f32 %v438_v26, %v405_v15  ;;  %3142 = vst [vmem:[#allocation7_spill] sm:$0xff] %v2292_v46  ;;  %v1533_v50 = vld [vmem:[%s2146_s17 + $0x30] sm:$0x7f]  ;;  %v1539_v2 = vld [vmem:[%s2146_s17 + $0x180] sm:$0x7f] }
  0x41   : > { %v455_v47 = vadd.f32 %v439_v31, %v406_v18  ;;  %v481_v44 = vmul.f32 %v1517_v22, %v2271_v17  ;;  %v482_v48 = vmul.f32 %v1518_v27, %v2271_v17  ;;  %v483_v49 = vmul.f32 %v1519_v29, %v2271_v17  ;;  %v1537_v0 = vld [vmem:[%s2146_s17 + $0x110] sm:$0x7f]  ;;  %v1540_v8 = vld [vmem:[%s2146_s17 + $0x1b8] sm:$0x7f] }
  0x42   : > { %v484_v51 = vmul.f32 %v1520_v30, %v2271_v17  ;;  %v485_v52 = vmul.f32 %v1521_v37, %v2271_v17  ;;  %v486_v53 = vmul.f32 %v1522_v38, %v2271_v17  ;;  %v487_v55 = vmul.f32 %v1523_v39, %v2271_v17 }
  0x43   : > { %v488_v60 = vmul.f32 %v1524_v45, %v2271_v17  ;;  %v497_v61 = vadd.f32 %v481_v44, %v448_v32  ;;  %v498_v62 = vadd.f32 %v482_v48, %v449_v33  ;;  %v499_v63 = vadd.f32 %v483_v49, %v450_v36  ;;  %v247_v17 = vld [vmem:[%s2146_s17 + $0x268] sm:$0x7f] }
  0x44   : > { %v500_v3 = vadd.f32 %v484_v51, %v451_v40  ;;  %v501_v4 = vadd.f32 %v485_v52, %v452_v41  ;;  %v502_v5 = vadd.f32 %v486_v53, %v453_v42  ;;  %v503_v6 = vadd.f32 %v487_v55, %v454_v43 }
  0x45   : > { %v504_v9 = vadd.f32 %v488_v60, %v455_v47  ;;  %v530_v10 = vmul.f32 %v1533_v50, %v2292_v46  ;;  %v531_v11 = vmul.f32 %v1534_v57, %v2292_v46  ;;  %v532_v12 = vmul.f32 %v1535_v58, %v2292_v46 }
  0x46   : > { %v533_v13 = vmul.f32 %v1536_v59, %v2292_v46  ;;  %v534_v14 = vmul.f32 %v1537_v0, %v2292_v46  ;;  %v535_v15 = vmul.f32 %v1538_v1, %v2292_v46  ;;  %v536_v16 = vmul.f32 %v1539_v2, %v2292_v46 }
  0x47   : > { %v537_v18 = vmul.f32 %v1540_v8, %v2292_v46  ;;  %v546_v19 = vadd.f32 %v530_v10, %v497_v61  ;;  %v547_v20 = vadd.f32 %v531_v11, %v498_v62  ;;  %v548_v21 = vadd.f32 %v532_v12, %v499_v63  ;;  %v246_v46 = vld [vmem:[%s2146_s17 + $0x230] sm:$0x7f] }
  0x48   : > { %v549_v22 = vadd.f32 %v533_v13, %v500_v3  ;;  %v550_v23 = vadd.f32 %v534_v14, %v501_v4  ;;  %v551_v24 = vadd.f32 %v535_v15, %v502_v5  ;;  %v552_v25 = vadd.f32 %v536_v16, %v503_v6  ;;  %v2329_v13 = vld [vmem:[%s3113_s2] ss:$0 sm:$0xff] }
  0x49   : > { %v553_v26 = vadd.f32 %v537_v18, %v504_v9  ;;  %v563_v27 = vsel %vm562_vm0, %v546_v19, 0.0  ;;  %v570_v29 = vsel %vm562_vm0, %v547_v20, 0.0  ;;  %v577_v30 = vsel %vm562_vm0, %v548_v21, 0.0  ;;  %3143 = vst [vmem:[#allocation8_spill] sm:$0xff] %v2329_v13 }
  0x4a   : > { %v564_v31 = vrot.slane %v563_v27, 4  ;;  %v571_v32 = vrot.slane %v570_v29, 4  ;;  %v578_v33 = vrot.slane %v577_v30, 4  ;;  %v584_v36 = vsel %vm562_vm0, %v549_v22, 0.0 }
  0x4b   : > { %v585_v37 = vrot.slane %v584_v36, 4  ;;  %v591_v38 = vsel %vm562_vm0, %v550_v23, 0.0  ;;  %v598_v39 = vsel %vm562_vm0, %v551_v24, 0.0  ;;  %v605_v40 = vsel %vm562_vm0, %v552_v25, 0.0  ;;  %v2334_v23 = vld [vmem:[%s3114_s3 + $0x20] sm:$0xff]  ;;  %v2339_v24 = vld [vmem:[%s3114_s3 + $0x70] sm:$0xff] }
  0x4c   : > { %v565_v41 = vadd.f32 %v564_v31, %v563_v27  ;;  %v572_v42 = vadd.f32 %v571_v32, %v570_v29  ;;  %v579_v43 = vadd.f32 %v578_v33, %v577_v30  ;;  %v592_v45 = vrot.slane %v591_v38, 4  ;;  %v2344_v25 = vld [vmem:[%s3114_s3 + $0x30] sm:$0xff]  ;;  %v2352_v31 = vld [vmem:[%s3114_s3 + $0x80] sm:$0xff]  ;;  %v2357_v32 = vld [vmem:[%s3114_s3 + $0xc8] sm:$0xff] }
  0x4d   : > { %v586_v47 = vadd.f32 %v585_v37, %v584_v36  ;;  %v599_v44 = vrot.slane %v598_v39, 4  ;;  %v606_v48 = vrot.slane %v605_v40, 4  ;;  %v612_v49 = vsel %vm562_vm0, %v553_v26, 0.0  ;;  %v2362_v33 = vld [vmem:[%s3114_s3 + $0x118] sm:$0xff] }
  0x4e   : > { %v566_v50 = vrot.slane %v565_v41, 2  ;;  %v573_v51 = vrot.slane %v572_v42, 2  ;;  %v580_v52 = vrot.slane %v579_v43, 2  ;;  %v593_v53 = vadd.f32 %v592_v45, %v591_v38  ;;  %v2388_v45 = vld [vmem:[%s3114_s3 + $0xd0] sm:$0xff] }
  0x4f   : > { %v587_v55 = vrot.slane %v586_v47, 2  ;;  %v600_v57 = vadd.f32 %v599_v44, %v598_v39  ;;  %v607_v58 = vadd.f32 %v606_v48, %v605_v40  ;;  %v613_v59 = vrot.slane %v612_v49, 4  ;;  %v2368_v40 = vld [vmem:[%s3114_s3 + $0xd8] sm:$0xff] }
  0x50   : > { %v567_v60 = vadd.f32 %v566_v50, %v565_v41  ;;  %v574_v61 = vadd.f32 %v573_v51, %v572_v42  ;;  %v581_v62 = vadd.f32 %v580_v52, %v579_v43  ;;  %v594_v63 = vrot.slane %v593_v53, 2  ;;  %v2373_v41 = vld [vmem:[%s3114_s3 + $0x128] sm:$0xff]  ;;  %v2378_v42 = vld [vmem:[%s3114_s3 + $0xc0] sm:$0xff]  ;;  %v2383_v43 = vld [vmem:[%s3114_s3 + $0x110] sm:$0xff] }
  0x51   : > { %v588_v0 = vadd.f32 %v587_v55, %v586_v47  ;;  %v601_v1 = vrot.slane %v600_v57, 2  ;;  %v608_v2 = vrot.slane %v607_v58, 2  ;;  %v614_v3 = vadd.f32 %v613_v59, %v612_v49  ;;  %v2393_v47 = vld [vmem:[%s3114_s3 + $0x120] sm:$0xff]  ;;  %v2401_v51 = vld [vmem:[%s3114_s3 + $0x168] sm:$0xff]  ;;  %v2406_v52 = vld [vmem:[%s3114_s3 + $0x1b8] sm:$0xff] }
  0x52   : > { %v568_v4 = vrot.slane %v567_v60, 1  ;;  %v575_v5 = vrot.slane %v574_v61, 1  ;;  %v582_v6 = vrot.slane %v581_v62, 1  ;;  %v595_v8 = vadd.f32 %v594_v63, %v593_v53  ;;  %v2411_v53 = vld [vmem:[%s3114_s3 + $0x178] sm:$0xff]  ;;  %v2416_v55 = vld [vmem:[%s3114_s3 + $0x1c8] sm:$0xff]  ;;  %v2433_v63 = vld [vmem:[%s3114_s3 + $0x170] sm:$0xff] }
  0x53   : > { %v589_v9 = vrot.slane %v588_v0, 1  ;;  %v602_v10 = vadd.f32 %v601_v1, %v600_v57  ;;  %v609_v11 = vadd.f32 %v608_v2, %v607_v58  ;;  %v615_v12 = vrot.slane %v614_v3, 2  ;;  %v2443_v1 = vld [vmem:[%s3114_s3 + $0x208] sm:$0xff]  ;;  %v2448_v2 = vld [vmem:[%s3114_s3 + $0x258] sm:$0xff]  ;;  %v2635_v50 = vld [vmem:[%s3114_s3 + $0x3f0] sm:$0xff] }
  0x54   : > { %v569_v14 = vadd.f32 %v568_v4, %v567_v60  ;;  %v576_v15 = vadd.f32 %v575_v5, %v574_v61  ;;  %v583_v16 = vadd.f32 %v582_v6, %v581_v62  ;;  %v596_v18 = vrot.slane %v595_v8, 1  ;;  %v2423_v61 = vld [vmem:[%s3114_s3 + $0x160] sm:$0xff]  ;;  %v2428_v62 = vld [vmem:[%s3114_s3 + $0x1b0] sm:$0xff]  ;;  %v2611_v6 = vld [vmem:[%s3114_s3 + $0x448] sm:$0xff]  ;;  %3150 = vst [vmem:[#allocation15_spill] sm:$0xff] %v2635_v50 }
  0x55   : > { %v590_v19 = vadd.f32 %v589_v9, %v588_v0  ;;  %v603_v20 = vrot.slane %v602_v10, 1  ;;  %v610_v21 = vrot.slane %v609_v11, 1  ;;  %v616_v22 = vadd.f32 %v615_v12, %v614_v3  ;;  %v2438_v0 = vld [vmem:[%s3114_s3 + $0x1c0] sm:$0xff]  ;;  %v2463_v9 = vld [vmem:[%s3114_s3 + $0x268] sm:$0xff]  ;;  %v2478_v12 = vld [vmem:[%s3114_s3 + $0x210] sm:$0xff] }
  0x56   : > { %v597_v26 = vadd.f32 %v596_v18, %v595_v8  ;;  %v682_v27 = vadd.f32 %v2329_v13, %v569_v14  ;;  %v683_v29 = vadd.f32 %v2329_v13, %v576_v15  ;;  %v684_v30 = vadd.f32 %v2329_v13, %v583_v16  ;;  %v2458_v8 = vld [vmem:[%s3114_s3 + $0x218] sm:$0xff]  ;;  %v2483_v14 = vld [vmem:[%s3114_s3 + $0x260] sm:$0xff]  ;;  %v1461_v5 = vld [vmem:[%s2146_s17 + $0x1c8] sm:$0x7f] }
  0x57   : > { %v604_v36 = vadd.f32 %v603_v20, %v602_v10  ;;  %v611_v37 = vadd.f32 %v610_v21, %v609_v11  ;;  %v617_v38 = vrot.slane %v616_v22, 1  ;;  %v685_v39 = vadd.f32 %v2329_v13, %v590_v19  ;;  %v2468_v10 = vld [vmem:[%s3114_s3 + $0x200] sm:$0xff]  ;;  %v2473_v11 = vld [vmem:[%s3114_s3 + $0x250] sm:$0xff]  ;;  %v2490_v20 = vld [vmem:[%s3114_s3 + $0x2a8] sm:$0xff] }
  0x58   : > { %v686_v44 = vadd.f32 %v2329_v13, %v597_v26  ;;  %v928_v48 = vrot.slane %v683_v29, 7  ;;  %v931_v49 = vrot.slane %v684_v30, 6  ;;  %v2495_v21 = vld [vmem:[%s3114_s3 + $0x2f8] sm:$0xff]  ;;  %v2505_v26 = vld [vmem:[%s3114_s3 + $0x308] sm:$0xff]  ;;  %v2515_v29 = vld [vmem:[%s3114_s3 + $0x2f0] sm:$0xff]  ;;  %v3152_v54 = vpack.c.bf16 %v2339_v24, %v2334_v23 }
  0x59   : > { %v618_v57 = vadd.f32 %v617_v38, %v616_v22  ;;  %v687_v58 = vadd.f32 %v2329_v13, %v604_v36  ;;  %v688_v59 = vadd.f32 %v2329_v13, %v611_v37  ;;  %v934_v60 = vrot.slane %v685_v39, 5  ;;  %v2500_v22 = vld [vmem:[%s3114_s3 + $0x2b8] sm:$0xff]  ;;  %v2527_v39 = vld [vmem:[%s3114_s3 + $0x2b0] sm:$0xff]  ;;  %v2589_v37 = vld [vmem:[%s3114_s3 + $0x3e8] sm:$0xff] }
  0x5a   : > { %v930_v3 = vsel %vm929_vm1, %v928_v48, %v682_v27  ;;  %v937_v4 = vrot.slane %v686_v44, 4  ;;  %v2510_v27 = vld [vmem:[%s3114_s3 + $0x2a0] sm:$0xff]  ;;  %v1655_v36 = vpack.c.bf16 %v2373_v41, %v2368_v40  ;;  %v2537_v40 = vld [vmem:[%s3114_s3 + $0x348] sm:$0xff]  ;;  %v2542_v41 = vld [vmem:[%s3114_s3 + $0x398] sm:$0xff]  ;;  %v3155_v38 = vmov 0.0  }
  0x5b   : > { %v689_v15 = vadd.f32 %v2329_v13, %v618_v57  ;;  %v933_v16 = vsel %vm932_vm2, %v931_v49, %v930_v3  ;;  %v940_v18 = vrot.slane %v687_v58, 3  ;;  %v943_v19 = vrot.slane %v688_v59, 2  ;;  %v2532_v44 = vld [vmem:[%s3114_s3 + $0x300] sm:$0xff]  ;;  %v2547_v48 = vld [vmem:[%s3114_s3 + $0x358] sm:$0xff]  ;;  %v2552_v49 = vld [vmem:[%s3114_s3 + $0x3a8] sm:$0xff] }
  0x5c   : > { %v936_v30 = vsel %vm935_vm3, %v934_v60, %v933_v16  ;;  %3144 = vst [vmem:[#allocation9_spill] sm:$0xff] %v2547_v48  ;;  %3145 = vst [vmem:[#allocation10_spill] sm:$0xff] %v2552_v49  ;;  %v2562_v3 = vld [vmem:[%s3114_s3 + $0x340] sm:$0xff]  ;;  %v2567_v16 = vld [vmem:[%s3114_s3 + $0x390] sm:$0xff] }
  0x5d   : > { %v939_v57 = vsel %vm938_vm4, %v937_v4, %v936_v30  ;;  %v946_v58 = vrot.slane %v689_v15, 1  ;;  %v2572_v4 = vld [vmem:[%s3114_s3 + $0x350] sm:$0xff]  ;;  %v2577_v15 = vld [vmem:[%s3114_s3 + $0x3a0] sm:$0xff]  ;;  %v245_v13 = vld [vmem:[%s2146_s17 + $0x1f8] sm:$0x7f] }
  0x5e   : > { %v942_v30 = vsel %vm941_vm5, %v940_v18, %v939_v57  ;;  %v2599_v18 = vld [vmem:[%s3114_s3 + $0x3f8] sm:$0xff]  ;;  %v248_v48 = vld [vmem:[%s2146_s17 + $0x2a0] sm:$0x7f]  ;;  %v250_v23 = vld [vmem:[%s2146_s17 + $0x310] sm:$0x7f] }
  0x5f   : > { %3146 = vst [vmem:[#allocation11_spill] sm:$0xff] %v2599_v18  ;;  %v945_v57 = vsel %vm944_vm6, %v943_v19, %v942_v30  ;;  %v2616_v19 = vld [vmem:[%s3114_s3 + $0x3e0] sm:$0xff]  ;;  %v2621_v30 = vld [vmem:[%s3114_s3 + $0x430] sm:$0xff]  ;;  %v249_v49 = vld [vmem:[%s2146_s17 + $0x2d8] sm:$0x7f]  ;;  %v264_v50 = vmul.f32 %v248_v48, %v2166_v34  ;;  %v293_v48 = vmul.f32 %v1461_v5, %v2171_v35 }
  0x60   : > { %3147 = vst [vmem:[#allocation12_spill] sm:$0xff] %v2616_v19  ;;  %3148 = vst [vmem:[#allocation13_spill] sm:$0xff] %v2621_v30  ;;  %v2624_v60 = vsel %vm947_vm7, %v946_v58, %v945_v57  ;;  %v2640_v58 = vld [vmem:[%s3114_s3 + $0x440] sm:$0xff]  ;;  %v1465_v24 = vld [vmem:[%s2146_s17 + $0x2a8] sm:$0x7f]  ;;  %v266_v19 = vmul.f32 %v250_v23, %v2166_v34 }
  0x61   : > { %3149 = vst [vmem:[#allocation14_spill] sm:$0xff] %v2624_v60  ;;  %3151 = vst [vmem:[#allocation16_spill] sm:$0xff] %v2640_v58  ;;  %v244_v57 = vld [vmem:[%s2146_s17 + $0x1c0] sm:$0x7f]  ;;  %1030 = vmatmul.mubr.f32.vlgmr.msra.gmra.mrb[0].mxu0 %v2624_v60  ;;  %1107 = vmatmul.mubr.f32.vlgmr.msra.gmra.mrb[0].mxu1 %v2624_v60  ;;  %v3153_v60 = vpack.c.bf16 %v2352_v31, %v2344_v25  ;;  %v1464_v25 = vld [vmem:[%s2146_s17 + $0x270] sm:$0x7f]  ;;  %v263_v31 = vmul.f32 %v247_v17, %v2166_v34 }
  0x62   : > { %1622 = vmatpush1.bf16.msra.mxu0 %v3152_v54  ;;  %v3154_v54 = vpack.c.bf16 %v2362_v33, %v2357_v32  ;;  %v1462_v59 = vld [vmem:[%s2146_s17 + $0x200] sm:$0x7f]  ;;  %1035 = vmatprep.mubr.f32.mxu0 %v3155_v38  ;;  %v260_v32 = vmul.f32 %v244_v57, %v2166_v34  ;;  %v261_v33 = vmul.f32 %v245_v13, %v2166_v34  ;;  %v1468_v18 = vld [vmem:[%s2146_s17 + $0x350] sm:$0x7f]  ;;  %v1480_v23 = vld [vmem:[%s2146_s17 + $0x278] sm:$0x7f] }
  0x63   : > { %1654 = vmatpush1.bf16.msra.mxu1 %v3153_v60  ;;  %v251_v60 = vld [vmem:[%s2146_s17 + $0x348] sm:$0x7f]  ;;  %1112 = vmatprep.mubr.f32.mxu1 %v3155_v38  ;;  %v265_v58 = vmul.f32 %v249_v49, %v2166_v34  ;;  %v1466_v30 = vld [vmem:[%s2146_s17 + $0x2e0] sm:$0x7f]  ;;  %v1467_v38 = vld [vmem:[%s2146_s17 + $0x318] sm:$0x7f]  ;;  %v3156_v13 = vpack.c.bf16 %v2383_v43, %v2378_v42  ;;  %v294_v49 = vmul.f32 %v1462_v59, %v2171_v35 }
  0x64   : > { %1624 = vmatprep.subr.bf16.mxu0 %v3154_v54  ;;  %1656 = vmatprep.subr.bf16.mxu1 %v1655_v36  ;;  %v262_v36 = vmul.f32 %v246_v46, %v2166_v34  ;;  %v1463_v54 = vld [vmem:[%s2146_s17 + $0x238] sm:$0x7f]  ;;  %v3157_v46 = vpack.c.bf16 %v2393_v47, %v2388_v45  ;;  %v267_v17 = vmul.f32 %v251_v60, %v2166_v34  ;;  %v1477_v47 = vld [vmem:[%s2146_s17 + $0x1d0] sm:$0x7f] }
  0x65   : > { %v3158_v57 = vpack.c.bf16 %v2406_v52, %v2401_v51  ;;  %v3159_v42 = vpack.c.bf16 %v2416_v55, %v2411_v53  ;;  %v295_v43 = vmul.f32 %v1463_v54, %v2171_v35  ;;  %v296_v45 = vmul.f32 %v1464_v25, %v2171_v35  ;;  %v1478_v53 = vld [vmem:[%s2146_s17 + $0x208] sm:$0x7f]  ;;  %v1479_v55 = vld [vmem:[%s2146_s17 + $0x240] sm:$0x7f]  ;;  %v1481_v25 = vld [vmem:[%s2146_s17 + $0x2b0] sm:$0x7f] }
  0x66   : > { %1626 = vmatpush1.bf16.msra.mxu0 %v3156_v13  ;;  %v297_v34 = vmul.f32 %v1465_v24, %v2171_v35  ;;  %v298_v5 = vmul.f32 %v1466_v30, %v2171_v35  ;;  %v299_v59 = vmul.f32 %v1467_v38, %v2171_v35  ;;  %v300_v51 = vmul.f32 %v1468_v18, %v2171_v35 }
  0x67   : > { %1658 = vmatpush1.bf16.msra.mxu1 %v3157_v46  ;;  %1628 = vmatprep.subr.bf16.mxu0 %v3158_v57  ;;  %v309_v52 = vadd.f32 %v293_v48, %v260_v32  ;;  %v310_v60 = vadd.f32 %v294_v49, %v261_v33  ;;  %v311_v54 = vadd.f32 %v295_v43, %v262_v36  ;;  %v1482_v57 = vld [vmem:[%s2146_s17 + $0x2e8] sm:$0x7f]  ;;  %v1484_v32 = vld [vmem:[%s2146_s17 + $0x358] sm:$0x7f]  ;;  %v1496_v49 = vld [vmem:[%s2146_s17 + $0x280] sm:$0x7f] }
  0x68   : > { %1660 = vmatprep.subr.bf16.mxu1 %v3159_v42  ;;  %v312_v13 = vadd.f32 %v296_v45, %v263_v31  ;;  %v313_v46 = vadd.f32 %v297_v34, %v264_v50  ;;  %v1483_v42 = vld [vmem:[%s2146_s17 + $0x320] sm:$0x7f]  ;;  %v3160_v24 = vpack.c.bf16 %v2428_v62, %v2423_v61  ;;  %v3161_v35 = vpack.c.bf16 %v2438_v0, %v2433_v63  ;;  %v1495_v48 = vld [vmem:[%s2146_s17 + $0x248] sm:$0x7f]  ;;  %v1497_v43 = vld [vmem:[%s2146_s17 + $0x2b8] sm:$0x7f] }
  0x69   : > { %v314_v38 = vadd.f32 %v298_v5, %v265_v58  ;;  %v315_v18 = vadd.f32 %v299_v59, %v266_v19  ;;  %v316_v30 = vadd.f32 %v300_v51, %v267_v17  ;;  %v3162_v50 = vpack.c.bf16 %v2448_v2, %v2443_v1  ;;  %v1498_v51 = vld [vmem:[%s2146_s17 + $0x2f0] sm:$0x7f] }
  0x6a   : > { %1630 = vmatpush1.bf16.msra.mxu0 %v3160_v24  ;;  %v3163_v31 = vpack.c.bf16 %v2463_v9, %v2458_v8  ;;  %v342_v61 = vmul.f32 %v1477_v47, %v2198_v56  ;;  %v343_v62 = vmul.f32 %v1478_v53, %v2198_v56  ;;  %v344_v63 = vmul.f32 %v1479_v55, %v2198_v56  ;;  %v1493_v8 = vld [vmem:[%s2146_s17 + $0x1d8] sm:$0x7f]  ;;  %v1494_v9 = vld [vmem:[%s2146_s17 + $0x210] sm:$0x7f] }
  0x6b   : > { %1662 = vmatpush1.bf16.msra.mxu1 %v3161_v35  ;;  %1632 = vmatprep.subr.bf16.mxu0 %v3162_v50  ;;  %v345_v0 = vmul.f32 %v1480_v23, %v2198_v56  ;;  %v346_v19 = vmul.f32 %v1481_v25, %v2198_v56  ;;  %v347_v1 = vmul.f32 %v1482_v57, %v2198_v56  ;;  %v1511_v25 = vld [vmem:[%s2146_s17 + $0x250] sm:$0x7f]  ;;  %v1512_v57 = vld [vmem:[%s2146_s17 + $0x288] sm:$0x7f] }
  0x6c   : > { %1664 = vmatprep.subr.bf16.mxu1 %v3163_v31  ;;  %v348_v2 = vmul.f32 %v1483_v42, %v2198_v56  ;;  %v349_v58 = vmul.f32 %v1484_v32, %v2198_v56  ;;  %v358_v33 = vadd.f32 %v342_v61, %v309_v52  ;;  %v359_v36 = vadd.f32 %v343_v62, %v310_v60  ;;  %v1499_v56 = vld [vmem:[%s2146_s17 + $0x328] sm:$0x7f]  ;;  %v1500_v52 = vld [vmem:[%s2146_s17 + $0x360] sm:$0x7f]  ;;  %v1514_v32 = vld [vmem:[%s2146_s17 + $0x2f8] sm:$0x7f] }
  0x6d   : > { %v360_v17 = vadd.f32 %v344_v63, %v311_v54  ;;  %v3164_v45 = vpack.c.bf16 %v2473_v11, %v2468_v10  ;;  %v3165_v34 = vpack.c.bf16 %v2483_v14, %v2478_v12  ;;  %v361_v47 = vadd.f32 %v345_v0, %v312_v13  ;;  %v3171_v31 = vld [vmem:[#allocation10_spill] sm:$0xff]  ;;  %v3172_v61 = vld [vmem:[#allocation9_spill] sm:$0xff] }
  0x6e   : > { %v362_v5 = vadd.f32 %v346_v19, %v313_v46  ;;  %v363_v59 = vadd.f32 %v347_v1, %v314_v38  ;;  %v3166_v53 = vpack.c.bf16 %v2495_v21, %v2490_v20  ;;  %v3167_v10 = vpack.c.bf16 %v2505_v26, %v2500_v22  ;;  %v1509_v21 = vld [vmem:[%s2146_s17 + $0x1e0] sm:$0x7f]  ;;  %v1510_v46 = vld [vmem:[%s2146_s17 + $0x218] sm:$0x7f] }
  0x6f   : > { %1634 = vmatpush1.bf16.msra.mxu0 %v3164_v45  ;;  %1666 = vmatpush1.bf16.msra.mxu1 %v3165_v34  ;;  %v364_v11 = vadd.f32 %v348_v2, %v315_v18  ;;  %v365_v12 = vadd.f32 %v349_v58, %v316_v30  ;;  %v391_v14 = vmul.f32 %v1493_v8, %v2230_v28  ;;  %v1513_v30 = vld [vmem:[%s2146_s17 + $0x2c0] sm:$0x7f]  ;;  %v1525_v58 = vld [vmem:[%s2146_s17 + $0x1e8] sm:$0x7f]  ;;  %v1527_v45 = vld [vmem:[%s2146_s17 + $0x258] sm:$0x7f] }
  0x70   : > { %1636 = vmatprep.subr.bf16.mxu0 %v3166_v53  ;;  %1668 = vmatprep.subr.bf16.mxu1 %v3167_v10  ;;  %v392_v55 = vmul.f32 %v1494_v9, %v2230_v28  ;;  %v393_v23 = vmul.f32 %v1495_v48, %v2230_v28  ;;  %v394_v60 = vmul.f32 %v1496_v49, %v2230_v28  ;;  %v3174_v0 = vld [vmem:[#allocation5_spill] sm:$0xff]  ;;  %v1528_v34 = vld [vmem:[%s2146_s17 + $0x290] sm:$0x7f] }
  0x71   : > { %v395_v20 = vmul.f32 %v1497_v43, %v2230_v28  ;;  %v396_v22 = vmul.f32 %v1498_v51, %v2230_v28  ;;  %v397_v26 = vmul.f32 %v1499_v56, %v2230_v28  ;;  %v398_v54 = vmul.f32 %v1500_v52, %v2230_v28  ;;  %v1515_v28 = vld [vmem:[%s2146_s17 + $0x330] sm:$0x7f]  ;;  %v1530_v51 = vld [vmem:[%s2146_s17 + $0x300] sm:$0x7f]  ;;  %v1531_v56 = vld [vmem:[%s2146_s17 + $0x338] sm:$0x7f] }
  0x72   : > { %v407_v13 = vadd.f32 %v391_v14, %v358_v33  ;;  %v3168_v42 = vpack.c.bf16 %v2515_v29, %v2510_v27  ;;  %v3169_v24 = vpack.c.bf16 %v2532_v44, %v2527_v39  ;;  %v408_v35 = vadd.f32 %v392_v55, %v359_v36  ;;  %v1516_v44 = vld [vmem:[%s2146_s17 + $0x368] sm:$0x7f]  ;;  %v1526_v33 = vld [vmem:[%s2146_s17 + $0x220] sm:$0x7f]  ;;  %v1532_v52 = vld [vmem:[%s2146_s17 + $0x370] sm:$0x7f] }
  0x73   : > { %v409_v38 = vadd.f32 %v393_v23, %v360_v17  ;;  %v410_v18 = vadd.f32 %v394_v60, %v361_v47  ;;  %v3170_v50 = vpack.c.bf16 %v2542_v41, %v2537_v40  ;;  %v3173_v27 = vpack.c.bf16 %v3171_v31, %v3172_v61  ;;  %v1529_v47 = vld [vmem:[%s2146_s17 + $0x2c8] sm:$0x7f]  ;;  %v1541_v23 = vld [vmem:[%s2146_s17 + $0x1f0] sm:$0x7f]  ;;  %v1548_v31 = vld [vmem:[%s2146_s17 + $0x378] sm:$0x7f] }
  0x74   : > { %1638 = vmatpush1.bf16.msra.mxu0 %v3168_v42  ;;  %1670 = vmatpush1.bf16.msra.mxu1 %v3169_v24  ;;  %v411_v29 = vadd.f32 %v395_v20, %v362_v5  ;;  %v412_v62 = vadd.f32 %v396_v22, %v363_v59  ;;  %v413_v39 = vadd.f32 %v397_v26, %v364_v11  ;;  %v3178_v59 = vld [vmem:[#allocation11_spill] sm:$0xff]  ;;  %v1542_v60 = vld [vmem:[%s2146_s17 + $0x228] sm:$0x7f]  ;;  %v3181_v20 = vld [vmem:[#allocation13_spill] sm:$0xff] }
  0x75   : > { %1640 = vmatprep.subr.bf16.mxu0 %v3170_v50  ;;  %1672 = vmatprep.subr.bf16.mxu1 %v3173_v27  ;;  %v414_v63 = vadd.f32 %v398_v54, %v365_v12  ;;  %v440_v19 = vmul.f32 %v1509_v21, %v3174_v0  ;;  %v441_v1 = vmul.f32 %v1510_v46, %v3174_v0  ;;  %v3182_v21 = vld [vmem:[#allocation12_spill] sm:$0xff]  ;;  %v3185_v54 = vld [vmem:[#allocation15_spill] sm:$0xff]  ;;  %v1543_v42 = vld [vmem:[%s2146_s17 + $0x260] sm:$0x7f] }
  0x76   : > { %v442_v40 = vmul.f32 %v1511_v25, %v3174_v0  ;;  %v443_v41 = vmul.f32 %v1512_v57, %v3174_v0  ;;  %v444_v2 = vmul.f32 %v1513_v30, %v3174_v0  ;;  %v445_v8 = vmul.f32 %v1514_v32, %v3174_v0  ;;  %v3184_v26 = vld [vmem:[#allocation16_spill] sm:$0xff]  ;;  %v1547_v50 = vld [vmem:[%s2146_s17 + $0x340] sm:$0x7f] }
  0x77   : > { %v446_v9 = vmul.f32 %v1515_v28, %v3174_v0  ;;  %v3175_v36 = vpack.c.bf16 %v2567_v16, %v2562_v3  ;;  %v3176_v17 = vpack.c.bf16 %v2577_v15, %v2572_v4  ;;  %v447_v48 = vmul.f32 %v1516_v44, %v3174_v0  ;;  %v1544_v24 = vld [vmem:[%s2146_s17 + $0x298] sm:$0x7f]  ;;  %v1546_v28 = vld [vmem:[%s2146_s17 + $0x308] sm:$0x7f] }
  0x78   : > { %v456_v49 = vadd.f32 %v440_v19, %v407_v13  ;;  %v457_v43 = vadd.f32 %v441_v1, %v408_v35  ;;  %v3177_v5 = vpack.c.bf16 %v2594_v7, %v2589_v37  ;;  %v3179_v3 = vpack.c.bf16 %v2611_v6, %v3178_v59  ;;  %v3180_v7 = vld [vmem:[#allocation6_spill] sm:$0xff]  ;;  %v1545_v35 = vld [vmem:[%s2146_s17 + $0x2d0] sm:$0x7f]  ;;  %s218_s17 = sand.u32 1, %s1830_s19  }
  0x79   : > { %1642 = vmatpush1.bf16.msra.mxu0 %v3175_v36  ;;  %1674 = vmatpush1.bf16.msra.mxu1 %v3176_v17  ;;  %v458_v16 = vadd.f32 %v442_v40, %v409_v38  ;;  %v459_v4 = vadd.f32 %v443_v41, %v410_v18  ;;  %v460_v15 = vadd.f32 %v444_v2, %v411_v29  ;;  %s1731_s11 = smul.u32 160, %s218_s17  ;;  %s3070_s22 = scalar_lea.sflag [#allocation3], %s218_s17 }
  0x7a   : > { %1644 = vmatprep.subr.bf16.mxu0 %v3177_v5  ;;  %1676 = vmatprep.subr.bf16.mxu1 %v3179_v3  ;;  %v461_v53 = vadd.f32 %v445_v8, %v412_v62  ;;  %v462_v10 = vadd.f32 %v446_v9, %v413_v39  ;;  %v463_v11 = vadd.f32 %v447_v48, %v414_v63  ;;  %v3187_v39 = vld [vmem:[#allocation7_spill] sm:$0xff] }
  0x7b   : > { %v489_v37 = vmul.f32 %v1525_v58, %v3180_v7  ;;  %v490_v12 = vmul.f32 %v1526_v33, %v3180_v7  ;;  %v491_v6 = vmul.f32 %v1527_v45, %v3180_v7  ;;  %v492_v14 = vmul.f32 %v1528_v34, %v3180_v7  ;;  %s3026_s12 = scalar_lea.vmem [#allocation2], %s1731_s11 }
  0x7c   : > { %v493_v55 = vmul.f32 %v1529_v47, %v3180_v7  ;;  %v3183_v22 = vpack.c.bf16 %v3181_v20, %v3182_v21  ;;  %v3186_v13 = vpack.c.bf16 %v3184_v26, %v3185_v54  ;;  %v494_v46 = vmul.f32 %v1530_v51, %v3180_v7  ;;  %s1385_s15 = sshll.u32 %s3026_s12, 4  ;;  %s3062_s15 = int_to_ptr.vmem [resolvable:$true] %s1385_s15 }
  0x7d   : > { %v495_v25 = vmul.f32 %v1531_v56, %v3180_v7  ;;  %v496_v57 = vmul.f32 %v1532_v52, %v3180_v7  ;;  %v505_v38 = vadd.f32 %v489_v37, %v456_v49  ;;  %v506_v18 = vadd.f32 %v490_v12, %v457_v43  ;;  %s1776_s6 = scalar_lea.vmem %s3062_s15, 2560  ;;  %p1783_p0 = scmp.lt.s32.totalorder %s3062_s15, %s1781_s7 }
  0x7e   : > { %1646 = vmatpush1.bf16.msra.mxu0 %v3183_v22  ;;  %1678 = vmatpush1.bf16.msra.mxu1 %v3186_v13  ;;  %v507_v30 = vadd.f32 %v491_v6, %v458_v16  ;;  %v508_v32 = vadd.f32 %v492_v14, %v459_v4  ;;  %v509_v61 = vadd.f32 %v493_v55, %v460_v15  ;;  %p1777_p11 = scmp.ne.s32.totalorder %s3062_s15, %s1776_s6  ;;  %p1784_p1 = scmp.lt.s32.totalorder %s1782_s8, %s1776_s6 }
  0x7f   : > { %v510_v27 = vadd.f32 %v494_v46, %v461_v53  ;;  %v511_v29 = vadd.f32 %v495_v25, %v462_v10  ;;  %v512_v62 = vadd.f32 %v496_v57, %v463_v11  ;;  %v538_v44 = vmul.f32 %v1541_v23, %v3187_v39 }
  0x80   : > { %v539_v63 = vmul.f32 %v1542_v60, %v3187_v39  ;;  %v540_v0 = vmul.f32 %v1543_v42, %v3187_v39  ;;  %v541_v19 = vmul.f32 %v1544_v24, %v3187_v39  ;;  %v542_v1 = vmul.f32 %v1545_v35, %v3187_v39  ;;  %p1778_p12 = pnand %p1777_p11, %p1912_p5  ;;  %p1785_p2 = por %p1784_p1, %p1783_p0 }
  0x81   : > { %v543_v40 = vmul.f32 %v1546_v28, %v3187_v39  ;;  %v544_v41 = vmul.f32 %v1547_v50, %v3187_v39  ;;  %v545_v2 = vmul.f32 %v1548_v31, %v3187_v39  ;;  %v554_v8 = vadd.f32 %v538_v44, %v505_v38 }
  0x82   : > { %v555_v9 = vadd.f32 %v539_v63, %v506_v18  ;;  %v556_v58 = vadd.f32 %v540_v0, %v507_v30  ;;  %v557_v33 = vadd.f32 %v541_v19, %v508_v32  ;;  %v558_v36 = vadd.f32 %v542_v1, %v509_v61  ;;  %v843_v1 = vld [vmem:[%s3114_s3 + $0x488] sm:$0xff]  ;;  %p1779_p13 = pneg %p1778_p12 }
  0x83   : > { %v559_v17 = vadd.f32 %v543_v40, %v510_v27  ;;  %v560_v48 = vadd.f32 %v544_v41, %v511_v29  ;;  %v561_v49 = vadd.f32 %v545_v2, %v512_v62  ;;  %v619_v43 = vsel %vm562_vm0, %v554_v8, 0.0  ;;  %v853_v40 = vld [vmem:[%s3114_s3 + $0x4d8] sm:$0xff] }
  0x84   : > { %v626_v45 = vsel %vm562_vm0, %v555_v9, 0.0  ;;  %v633_v34 = vsel %vm562_vm0, %v556_v58, 0.0  ;;  %v640_v47 = vsel %vm562_vm0, %v557_v33, 0.0  ;;  %v620_v5 = vrot.slane %v619_v43, 4  ;;  %v3188_v41 = vld [vmem:[#allocation8_spill] sm:$0xff]  ;;  %p1786_p3 = pnand %p1785_p2, %p1779_p13 }
  0x85   : > { %v627_v59 = vrot.slane %v626_v45, 4  ;;  %v634_v3 = vrot.slane %v633_v34, 4  ;;  %v641_v16 = vrot.slane %v640_v47, 4  ;;  %v647_v4 = vsel %vm562_vm0, %v558_v36, 0.0  ;;  %v845_v33 = vld [vmem:[%s3114_s3 + $0x498] sm:$0xff]  ;;  %v855_v36 = vld [vmem:[%s3114_s3 + $0x4e8] sm:$0xff] }
  0x86   : > { %v654_v15 = vsel %vm562_vm0, %v559_v17, 0.0  ;;  %v661_v51 = vsel %vm562_vm0, %v560_v48, 0.0  ;;  %v668_v56 = vsel %vm562_vm0, %v561_v49, 0.0  ;;  %v621_v52 = vadd.f32 %v620_v5, %v619_v43  ;;  %v842_v17 = vld [vmem:[%s3114_s3 + $0x480] sm:$0xff] }
  0x87   : > { %v628_v53 = vadd.f32 %v627_v59, %v626_v45  ;;  %v635_v10 = vadd.f32 %v634_v3, %v633_v34  ;;  %v642_v11 = vadd.f32 %v641_v16, %v640_v47  ;;  %v648_v7 = vrot.slane %v647_v4, 4  ;;  %v852_v34 = vld [vmem:[%s3114_s3 + $0x4d0] sm:$0xff]  ;;  %v854_v5 = vld [vmem:[%s3114_s3 + $0x4e0] sm:$0xff] }
  0x88   : > { %v655_v37 = vrot.slane %v654_v15, 4  ;;  %v662_v12 = vrot.slane %v661_v51, 4  ;;  %v669_v6 = vrot.slane %v668_v56, 4  ;;  %v622_v14 = vrot.slane %v621_v52, 2  ;;  %v844_v47 = vld [vmem:[%s3114_s3 + $0x490] sm:$0xff] }
  0x89   : > { %v629_v55 = vrot.slane %v628_v53, 2  ;;  %v636_v23 = vrot.slane %v635_v10, 2  ;;  %v643_v60 = vrot.slane %v642_v11, 2  ;;  %v649_v20 = vadd.f32 %v648_v7, %v647_v4 }
  0x8a   : > { %v656_v21 = vadd.f32 %v655_v37, %v654_v15  ;;  %v663_v22 = vadd.f32 %v662_v12, %v661_v51  ;;  %v670_v26 = vadd.f32 %v669_v6, %v668_v56  ;;  %v623_v54 = vadd.f32 %v622_v14, %v621_v52 }
  0x8b   : > { %v630_v13 = vadd.f32 %v629_v55, %v628_v53  ;;  %v637_v46 = vadd.f32 %v636_v23, %v635_v10  ;;  %v644_v25 = vadd.f32 %v643_v60, %v642_v11  ;;  %v650_v57 = vrot.slane %v649_v20, 2  ;;  %v707_v53 = vld [vmem:[%s3114_s3 + $0x48] sm:$0xff]  ;;  %v717_v10 = vld [vmem:[%s3114_s3 + $0x98] sm:$0xff] }
  0x8c   : > { %v657_v42 = vrot.slane %v656_v21, 2  ;;  %v664_v24 = vrot.slane %v663_v22, 2  ;;  %v671_v35 = vrot.slane %v670_v26, 2  ;;  %v624_v38 = vrot.slane %v623_v54, 1 }
  0x8d   : > { %v631_v18 = vrot.slane %v630_v13, 1  ;;  %v638_v30 = vrot.slane %v637_v46, 1  ;;  %v645_v32 = vrot.slane %v644_v25, 1  ;;  %v651_v28 = vadd.f32 %v650_v57, %v649_v20  ;;  %v727_v57 = vld [vmem:[%s3114_s3 + $0xe8] sm:$0xff] }
  0x8e   : > { %v658_v50 = vadd.f32 %v657_v42, %v656_v21  ;;  %v665_v31 = vadd.f32 %v664_v24, %v663_v22  ;;  %v672_v61 = vadd.f32 %v671_v35, %v670_v26  ;;  %v625_v27 = vadd.f32 %v624_v38, %v623_v54  ;;  %v737_v42 = vld [vmem:[%s3114_s3 + $0x138] sm:$0xff] }
  0x8f   : > { %v632_v29 = vadd.f32 %v631_v18, %v630_v13  ;;  %v639_v62 = vadd.f32 %v638_v30, %v637_v46  ;;  %v646_v39 = vadd.f32 %v645_v32, %v644_v25  ;;  %v652_v44 = vrot.slane %v651_v28, 1  ;;  %v706_v13 = vld [vmem:[%s3114_s3 + $0x40] sm:$0xff]  ;;  %v716_v46 = vld [vmem:[%s3114_s3 + $0x90] sm:$0xff]  ;;  %v747_v32 = vld [vmem:[%s3114_s3 + $0x188] sm:$0xff] }
  0x90   : > { %v659_v63 = vrot.slane %v658_v50, 1  ;;  %v666_v0 = vrot.slane %v665_v31, 1  ;;  %v673_v19 = vrot.slane %v672_v61, 1  ;;  %v690_v2 = vadd.f32 %v3188_v41, %v625_v27  ;;  %v726_v18 = vld [vmem:[%s3114_s3 + $0xe0] sm:$0xff]  ;;  %v736_v30 = vld [vmem:[%s3114_s3 + $0x130] sm:$0xff] }
  0x91   : > { %v691_v8 = vadd.f32 %v3188_v41, %v632_v29  ;;  %v692_v9 = vadd.f32 %v3188_v41, %v639_v62  ;;  %v693_v58 = vadd.f32 %v3188_v41, %v646_v39  ;;  %v653_v48 = vadd.f32 %v652_v44, %v651_v28  ;;  %v757_v28 = vld [vmem:[%s3114_s3 + $0x1d8] sm:$0xff]  ;;  %v746_v27 = vld [vmem:[%s3114_s3 + $0x180] sm:$0xff]  ;;  %v756_v29 = vld [vmem:[%s3114_s3 + $0x1d0] sm:$0xff] }
  0x92   : > { %v660_v49 = vadd.f32 %v659_v63, %v658_v50  ;;  %v667_v43 = vadd.f32 %v666_v0, %v665_v31  ;;  %v674_v45 = vadd.f32 %v673_v19, %v672_v61  ;;  %v1647_v4 = vpack.c.bf16 %v853_v40, %v843_v1  ;;  %v3190_v50 = vld [vmem:[#allocation14_spill] sm:$0xff]  ;;  %v777_v39 = vld [vmem:[%s3114_s3 + $0x278] sm:$0xff]  ;;  %v766_v0 = vld [vmem:[%s3114_s3 + $0x220] sm:$0xff] }
  0x93   : > { %v949_v59 = vrot.slane %v691_v8, 7  ;;  %v951_v3 = vrot.slane %v692_v9, 6  ;;  %v953_v16 = vrot.slane %v693_v58, 5  ;;  %v694_v15 = vadd.f32 %v3188_v41, %v653_v48  ;;  %v767_v62 = vld [vmem:[%s3114_s3 + $0x228] sm:$0xff]  ;;  %v776_v19 = vld [vmem:[%s3114_s3 + $0x270] sm:$0xff]  ;;  %v797_v40 = vld [vmem:[%s3114_s3 + $0x318] sm:$0xff] }
  0x94   : > { %v695_v51 = vadd.f32 %v3188_v41, %v660_v49  ;;  %v696_v56 = vadd.f32 %v3188_v41, %v667_v43  ;;  %v697_v52 = vadd.f32 %v3188_v41, %v674_v45  ;;  %1648 = vmatprep.subr.bf16.mxu0 %v1647_v4  ;;  %v1679_v7 = vpack.c.bf16 %v855_v36, %v845_v33  ;;  %v787_v1 = vld [vmem:[%s3114_s3 + $0x2c8] sm:$0xff]  ;;  %v786_v8 = vld [vmem:[%s3114_s3 + $0x2c0] sm:$0xff]  ;;  %v796_v9 = vld [vmem:[%s3114_s3 + $0x310] sm:$0xff] }
  0x95   : > { %v950_v11 = vsel %vm929_vm1, %v949_v59, %v690_v2  ;;  %v1649_v37 = vpack.c.bf16 %v852_v34, %v842_v17  ;;  %v1681_v12 = vpack.c.bf16 %v854_v5, %v844_v47  ;;  %v955_v14 = vrot.slane %v694_v15, 4  ;;  %v807_v58 = vld [vmem:[%s3114_s3 + $0x368] sm:$0xff]  ;;  %v817_v33 = vld [vmem:[%s3114_s3 + $0x3b8] sm:$0xff]  ;;  %v806_v48 = vld [vmem:[%s3114_s3 + $0x360] sm:$0xff] }
  0x96   : > { %v952_v6 = vsel %vm932_vm2, %v951_v3, %v950_v11  ;;  %v957_v55 = vrot.slane %v695_v51, 3  ;;  %v959_v23 = vrot.slane %v696_v56, 2  ;;  %v961_v20 = vrot.slane %v697_v52, 1  ;;  %1680 = vmatprep.subr.bf16.mxu1 %v1679_v7  ;;  %v816_v49 = vld [vmem:[%s3114_s3 + $0x3b0] sm:$0xff]  ;;  %v827_v43 = vld [vmem:[%s3114_s3 + $0x408] sm:$0xff]  ;;  %v837_v45 = vld [vmem:[%s3114_s3 + $0x458] sm:$0xff] }
  0x97   : > { %v954_v60 = vsel %vm935_vm3, %v953_v16, %v952_v6  ;;  %1650 = vmatpush1.bf16.msra.mxu0 %v1649_v37  ;;  %v1683_v21 = vpack.c.bf16 %v717_v10, %v707_v53  ;;  %1682 = vmatpush1.bf16.msra.mxu1 %v1681_v12  ;;  %v3189_v24 = vmov 0.0   ;;  %v1685_v35 = vpack.c.bf16 %v716_v46, %v706_v13  ;;  %v826_v5 = vld [vmem:[%s3114_s3 + $0x400] sm:$0xff]  ;;  %v836_v59 = vld [vmem:[%s3114_s3 + $0x450] sm:$0xff]  ;;  %v847_v3 = vld [vmem:[%s3114_s3 + $0x4a8] sm:$0xff] }
  0x98   : > { %v956_v22 = vsel %vm938_vm4, %v955_v14, %v954_v60  ;;  %v1687_v38 = vpack.c.bf16 %v737_v42, %v727_v57  ;;  %v1689_v31 = vpack.c.bf16 %v736_v30, %v726_v18  ;;  %v1691_v61 = vpack.c.bf16 %v757_v28, %v747_v32  ;;  %v857_v16 = vld [vmem:[%s3114_s3 + $0x4f8] sm:$0xff]  ;;  %v846_v51 = vld [vmem:[%s3114_s3 + $0x4a0] sm:$0xff]  ;;  %v856_v56 = vld [vmem:[%s3114_s3 + $0x4f0] sm:$0xff] }
  0x99   : > { %v958_v26 = vsel %vm941_vm5, %v957_v55, %v956_v22  ;;  %1684 = vmatprep.subr.bf16.mxu0 %v1683_v21  ;;  %1715 = vmatprep.subr.bf16.mxu1 %v1683_v21  ;;  %v1693_v44 = vpack.c.bf16 %v756_v29, %v746_v27  ;;  %v1695_v63 = vpack.c.bf16 %v777_v39, %v767_v62  ;;  %v862_v53 = vlaneseq  ;;  %v858_v37 = vld [vmem:[%s3115_s4] sm:$0xff] }
  0x9a   : > { %v960_v54 = vsel %vm944_vm6, %v959_v23, %v958_v26  ;;  %v1697_v41 = vpack.c.bf16 %v776_v19, %v766_v0  ;;  %v1699_v2 = vpack.c.bf16 %v797_v40, %v787_v1  ;;  %v1701_v36 = vpack.c.bf16 %v796_v9, %v786_v8 }
  0x9b   : > { %v2910_v25 = vsel %vm947_vm7, %v961_v20, %v960_v54  ;;  %v1703_v17 = vpack.c.bf16 %v817_v33, %v807_v58  ;;  %v1705_v34 = vpack.c.bf16 %v816_v49, %v806_v48  ;;  %v1707_v47 = vpack.c.bf16 %v837_v45, %v827_v43  ;;  %v859_v43 = vld [vmem:[%s3115_s4 + $0x8] sm:$0x3] }
  0x9c   : > { %1036 = vmatmul.mubr.f32.gmra.mrb[2].mxu0 %v2910_v25  ;;  %1113 = vmatmul.mubr.f32.gmra.mrb[2].mxu1 %v2910_v25  ;;  %v1709_v4 = vpack.c.bf16 %v836_v59, %v826_v5  ;;  %v1711_v15 = vpack.c.bf16 %v857_v16, %v847_v3  ;;  %v1713_v52 = vpack.c.bf16 %v856_v56, %v846_v51  ;;  %v3010_v10 = vshrl.u32 %v862_v53, 7 }
  0x9d   : > { %1183 = vmatprep.mubr.f32.mxu0 %v3189_v24  ;;  %1260 = vmatprep.mubr.f32.mxu1 %v3189_v24 }
  0x9e   : > { %v864_v11 = vsub.s32 0, %v3010_v10  ;;  %v872_v7 = vsub.s32 2, %v3010_v10  ;;  %v868_v12 = vsub.s32 1, %v3010_v10  ;;  %v876_v6 = vsub.s32 3, %v3010_v10 }
  0x9f   : > { %v880_v57 = vsub.s32 4, %v3010_v10  ;;  %v888_v42 = vsub.s32 6, %v3010_v10 }
  0xa0   : > { %1184 = vmatmul.mubr.f32.vlgmr.msra.gmra.mrb[4].mxu0 %v3190_v50  ;;  %1261 = vmatmul.mubr.f32.vlgmr.msra.gmra.mrb[4].mxu1 %v3190_v50  ;;  %v865_v14 = vrot.slane %v858_v37, %v864_v11  ;;  %v873_v55 = vrot.slane %v858_v37, %v872_v7  ;;  %v869_v23 = vrot.slane %v858_v37, %v868_v12 }
  0xa1   : > { %1686 = vmatpush1.bf16.msra.mxu0 %v1685_v35  ;;  %1723 = vmatpush1.bf16.msra.mxu1 %v1685_v35  ;;  %v877_v60 = vrot.slane %v858_v37, %v876_v6  ;;  %v892_v35 = vsub.s32 7, %v3010_v10  ;;  %v897_v45 = vrot.slane %v859_v43, %v864_v11 }
  0xa2   : > { %1688 = vmatprep.subr.bf16.mxu0 %v1687_v38  ;;  %1716 = vmatprep.subr.bf16.mxu1 %v1687_v38 }
  0xa3   : > { %1189 = vmatprep.mubr.f32.mxu0 %v3189_v24  ;;  %1266 = vmatprep.mubr.f32.mxu1 %v3189_v24  ;;  %v893_v39 = vrot.slane %v858_v37, %v892_v35 }
  0xa4   : > { %1190 = vmatmul.mubr.f32.gmra.mrb[6].mxu0 %v2910_v25  ;;  %1267 = vmatmul.mubr.f32.gmra.mrb[6].mxu1 %v2910_v25 }
  0xa5   : > { %1690 = vmatpush1.bf16.msra.mxu0 %v1689_v31  ;;  %1724 = vmatpush1.bf16.msra.mxu1 %v1689_v31  ;;  %v881_v31 = vrot.slane %v858_v37, %v880_v57 }
  0xa6   : > { %1692 = vmatprep.subr.bf16.mxu0 %v1691_v61  ;;  %1717 = vmatprep.subr.bf16.mxu1 %v1691_v61  ;;  %v889_v61 = vrot.slane %v858_v37, %v888_v42 }
  0xa7   : > { %1337 = vmatprep.mubr.f32.mxu0 %v3189_v24  ;;  %1343 = vmatprep.mubr.f32.mxu1 %v3189_v24  ;;  %v884_v24 = vsub.s32 5, %v3010_v10 }
  0xa9   : > { %1694 = vmatpush1.bf16.msra.mxu0 %v1693_v44  ;;  %1725 = vmatpush1.bf16.msra.mxu1 %v1693_v44  ;;  %v885_v62 = vrot.slane %v858_v37, %v884_v24 }
  0xaa   : > { %1696 = vmatprep.subr.bf16.mxu0 %v1695_v63  ;;  %1718 = vmatprep.subr.bf16.mxu1 %v1695_v63 }
  0xad   : > { %1698 = vmatpush1.bf16.msra.mxu0 %v1697_v41  ;;  %1726 = vmatpush1.bf16.msra.mxu1 %v1697_v41 }
  0xae   : > { %1700 = vmatprep.subr.bf16.mxu0 %v1699_v2  ;;  %1719 = vmatprep.subr.bf16.mxu1 %v1699_v2 }
  0xb1   : > { %1702 = vmatpush1.bf16.msra.mxu0 %v1701_v36  ;;  %1727 = vmatpush1.bf16.msra.mxu1 %v1701_v36 }
  0xb2   : > { %1704 = vmatprep.subr.bf16.mxu0 %v1703_v17  ;;  %1720 = vmatprep.subr.bf16.mxu1 %v1703_v17 }
  0xb5   : > { %1706 = vmatpush1.bf16.msra.mxu0 %v1705_v34  ;;  %1728 = vmatpush1.bf16.msra.mxu1 %v1705_v34  ;;  %v901_v34 = vrot.slane %v859_v43, %v868_v12 }
  0xb6   : > { %1708 = vmatprep.subr.bf16.mxu0 %v1707_v47  ;;  %1721 = vmatprep.subr.bf16.mxu1 %v1707_v47 }
  0xb9   : > { %1710 = vmatpush1.bf16.msra.mxu0 %v1709_v4  ;;  %1729 = vmatpush1.bf16.msra.mxu1 %v1709_v4 }
  0xba   : > { %1712 = vmatprep.subr.bf16.mxu0 %v1711_v15  ;;  %1722 = vmatprep.subr.bf16.mxu1 %v1711_v15 }
  0xbd   : > { %1714 = vmatpush1.bf16.msra.mxu0 %v1713_v52  ;;  %1730 = vmatpush1.bf16.msra.mxu1 %v1713_v52 }
  0xc0   : > { %1338 = vmatmul.mubr.f32.vlgmr.msra.gmra.mrb[8].mxu0 %v3190_v50  ;;  %1344 = vmatmul.mubr.f32.vlgmr.msra.gmra.mrb[8].mxu1 %v2910_v25 }
 0x134   : > { %v1031_v20 = vpop.f32.mrb[0].mxu0  ;;  %v1108_v21 = vpop.f32.mrb[0].mxu1 }
 0x135   : > { %v1032_v22 = vadd.f32 %v1031_v20, %v865_v14  ;;  %v1109_v26 = vadd.f32 %v1108_v21, %v873_v55  ;;  %v1033_v54 = vpop.f32.mrb[1].mxu0  ;;  %v1110_v13 = vpop.f32.mrb[1].mxu1 }
 0x136   : > { %v1034_v46 = vadd.f32 %v1033_v54, %v869_v23  ;;  %v1111_v25 = vadd.f32 %v1110_v13, %v877_v60 }
 0x137   : > { %1350 = vst [vmem:[%s3026_s12] sm:$0xff] %v1032_v22  ;;  %1352 = vst [vmem:[%s3026_s12 + $0x10] sm:$0xff] %v1109_v26 }
 0x138   : > { %1351 = vst [vmem:[%s3026_s12 + $0x8] sm:$0xff] %v1034_v46  ;;  %1353 = vst [vmem:[%s3026_s12 + $0x18] sm:$0xff] %v1111_v25 }
 0x16f   : > { %v1037_v38 = vpop.f32.mrb[2].mxu0  ;;  %v1114_v18 = vpop.f32.mrb[2].mxu1 }
 0x170   : > { %v1038_v30 = vadd.f32 %v1037_v38, %v865_v14  ;;  %v1115_v32 = vadd.f32 %v1114_v18, %v873_v55  ;;  %v1039_v28 = vpop.f32.mrb[3].mxu0  ;;  %v1116_v50 = vpop.f32.mrb[3].mxu1 }
 0x171   : > { %v1040_v27 = vadd.f32 %v1039_v28, %v869_v23  ;;  %v1117_v29 = vadd.f32 %v1116_v50, %v877_v60 }
 0x172   : > { %1360 = vst [vmem:[%s3026_s12 + $0x50] sm:$0xff] %v1038_v30  ;;  %1362 = vst [vmem:[%s3026_s12 + $0x60] sm:$0xff] %v1115_v32 }
 0x173   : > { %1361 = vst [vmem:[%s3026_s12 + $0x58] sm:$0xff] %v1040_v27  ;;  %1363 = vst [vmem:[%s3026_s12 + $0x68] sm:$0xff] %v1117_v29  ;;  %v1185_v44 = vpop.f32.mrb[4].mxu0  ;;  %v1262_v63 = vpop.f32.mrb[4].mxu1 }
 0x174   : > { %v1186_v0 = vadd.f32 %v1185_v44, %v881_v31  ;;  %v1263_v19 = vadd.f32 %v1262_v63, %v889_v61  ;;  %v1187_v1 = vpop.f32.mrb[5].mxu0  ;;  %v1264_v40 = vpop.f32.mrb[5].mxu1 }
 0x175   : > { %v1188_v41 = vadd.f32 %v1187_v1, %v885_v62  ;;  %v1265_v2 = vadd.f32 %v1264_v40, %v893_v39 }
 0x176   : > { %1354 = vst [vmem:[%s3026_s12 + $0x20] sm:$0xff] %v1186_v0  ;;  %1356 = vst [vmem:[%s3026_s12 + $0x30] sm:$0xff] %v1263_v19 }
 0x177   : > { %1355 = vst [vmem:[%s3026_s12 + $0x28] sm:$0xff] %v1188_v41  ;;  %1357 = vst [vmem:[%s3026_s12 + $0x38] sm:$0xff] %v1265_v2  ;;  %v1191_v8 = vpop.f32.mrb[6].mxu0  ;;  %v1268_v9 = vpop.f32.mrb[6].mxu1 }
 0x178   : > { %v1192_v58 = vadd.f32 %v1191_v8, %v881_v31  ;;  %v1269_v33 = vadd.f32 %v1268_v9, %v889_v61  ;;  %v1193_v36 = vpop.f32.mrb[7].mxu0  ;;  %v1270_v17 = vpop.f32.mrb[7].mxu1 }
 0x179   : > { %v1194_v48 = vadd.f32 %v1193_v36, %v885_v62  ;;  %v1271_v49 = vadd.f32 %v1270_v17, %v893_v39 }
 0x17a   : > { %1364 = vst [vmem:[%s3026_s12 + $0x70] sm:$0xff] %v1192_v58  ;;  %1366 = vst [vmem:[%s3026_s12 + $0x80] sm:$0xff] %v1269_v33 }
 0x17b   : > { %1365 = vst [vmem:[%s3026_s12 + $0x78] sm:$0xff] %v1194_v48  ;;  %1367 = vst [vmem:[%s3026_s12 + $0x88] sm:$0xff] %v1271_v49 }
 0x193   : > { %v1339_v47 = vpop.f32.mrb[8].mxu0  ;;  %v1345_v5 = vpop.f32.mrb[8].mxu1 }
 0x194   : > { %v1340_v59 = vadd.f32 %v1339_v47, %v897_v45  ;;  %v1346_v3 = vadd.f32 %v1345_v5, %v897_v45  ;;  %v1341_v16 = vpop.f32.mrb[9].mxu0  ;;  %v1347_v4 = vpop.f32.mrb[9].mxu1 }
 0x195   : > { %v1342_v15 = vadd.f32 %v1341_v16, %v901_v34  ;;  %v1348_v51 = vadd.f32 %v1347_v4, %v901_v34 }
 0x196   : > { %1358 = vst [vmem:[%s3026_s12 + $0x40] sm:$0xff] %v1340_v59  ;;  %1368 = vst [vmem:[%s3026_s12 + $0x90] sm:$0xff] %v1346_v3 }
 0x197   : > { %1359 = vst [vmem:[%s3026_s12 + $0x48] sm:$0xff] %v1342_v15  ;;  %1369 = vst [vmem:[%s3026_s12 + $0x98] sm:$0xff] %v1348_v51 }
 0x198   : > { %1789 = shalt.err (!%p1786_p3)
}
 0x199   : > { %s1790_s17 = scalar_lea.hbm %s3060_s26, 2560  ;;  %s1794_s11 = scalar_lea.hbm %s3116_s5, 5120 }
 0x19a   : > { %p1791_p4 = scmp.ne.s32.totalorder %s3060_s26, %s1790_s17  ;;  %p1795_p9 = scmp.lt.u32.totalorder %s3060_s26, %s3116_s5 }
 0x19b   : > { %p1796_p10 = scmp.lt.u32.totalorder %s1794_s11, %s1790_s17  ;;  %p1798_p12 = scmp.lt.u32.totalorder %s1790_s17, %s3060_s26 }
 0x19c   : > { %p1792_p7 = pnand %p1791_p4, %p1912_p5 }
 0x19d   : > { %p1797_p11 = por %p1796_p10, %p1795_p9 }
 0x19e   : > { %p1793_p8 = pneg %p1792_p7 }
 0x19f   : > { %p1799_p13 = por %p1798_p12, %p1797_p11 }
 0x1a1   : > { %p1800_p0 = pnand %p1799_p13, %p1793_p8 }
 0x1a3   : > { %1803 = shalt.err (!%p1800_p0)
}
 0x1a4   : > { %s1842_s30 = smov 1280   ;;  %s1843_s14 = smov 80  }
 0x1a5   : > { %1734 = dma.vmem_to_hbm [thread:$0]  (%p1912_p5), %s3062_s15, 2560, %s3060_s26, %s3070_s22, %s1842_s30, %s1842_s30, %s1843_s14  }
 0x1a6 PF: > { %p1740_p1 = scmp.ge.s32.totalorder %s1838_s21, 2  ;;  %s1400_s16 = sand.u32 1, %s1826_s18  }
 0x1a7   : > { %s1401_s23 = scalar_lea.sflag [#allocation3], %s1400_s16 }
 0x1a8   : > { %p1737_p2 = pnand %p1740_p1, %p1916_p6 }
 0x1aa   : > { %1821 = dma.done.wait (!%p1737_p2), %s1401_s23, 2560  }
 0x1ab   : > { %1823 = vsyncadd (!%p1737_p2), %s1401_s23, 4294964736  ;;  %p15_p3 = scmp.ge.s32.totalorder %s1899_s24, 4   ;;  %s3191_s18 = smov %s1830_s19 }
 0x1ac   : > { %s3192_s19 = smov %s1834_s20  ;;  %s3193_s20 = smov %s1910_s27 }
 0x1ad   : > { %s3194_s21 = smov %s1899_s24  ;;  %17 = sbr.rel (!%p15_p3) target bundleno = 3 (0x3), region = 81 }
 0x1b4   :  { %1406 = vsyncpa [#allocation3], 1 }
 0x1b5   :  { %1408 = vsyncpa [#allocation3 + $0x1], 1 }

</bundles_post_ra>
